<compile_context>
chip_gen: v7x
topology: tpu7x:2x2x1
jax: 0.10.0
libtpu: 0.0.40
codegen_flags: <defaults>
</compile_context>

<pallas_src>
import jax
import jax.numpy as jnp
from jax.experimental import pallas as pl
from jax.experimental.pallas import tpu as pltpu

# ---- model config (small, consistent with the module) ----
VOCAB = 50
MAX_LEN = 16
EMBED_SIZE = 32
HEADS = 4
DIM_HEAD = EMBED_SIZE // HEADS
FORWARD_EXPANSION = 4
FF_DIM = FORWARD_EXPANSION * EMBED_SIZE
NUM_LAYERS = 2
LN_EPS = 1e-5

BATCH = 2
SEQ = 8


def _layer_norm(h, gamma, beta):
    mu = jnp.mean(h, axis=-1, keepdims=True)
    var = jnp.mean((h - mu) ** 2, axis=-1, keepdims=True)   # population var (PyTorch LN)
    return (h - mu) * jax.lax.rsqrt(var + LN_EPS) * gamma + beta


# ---------------- Pallas kernel: one TransformerBlock per grid step ----------------
def encoder_kernel(x_ref, bias_ref, qkvo_ref, w1_ref, b1_ref, w2_ref, vec_ref,
                   out_ref, hid_ref):
    layer = pl.program_id(0)

    # Initialise the resident hidden state from the embedded input.
    @pl.when(layer == 0)
    def _():
        hid_ref[...] = x_ref[...]

    NS, E = hid_ref.shape
    N = bias_ref.shape[0]
    S = bias_ref.shape[2]
    Dh = E // HEADS

    x2 = hid_ref[...]                       # (N*S, E) f32
    x2b = x2.astype(jnp.bfloat16)

    # Per-layer weights (leading L axis squeezed away by the BlockSpec).
    wq = qkvo_ref[0]                        # (E, E) bf16, block-diag per-head proj
    wk = qkvo_ref[1]
    wv = qkvo_ref[2]
    wo = qkvo_ref[3]                        # (E, E) bf16
    w1 = w1_ref[...]                        # (E, FF) bf16
    w2 = w2_ref[...]                        # (FF, E) bf16
    b1 = b1_ref[...]                        # (1, FF) f32
    bo = vec_ref[0:1]                       # (1, E) f32
    b2 = vec_ref[1:2]
    ln1w = vec_ref[2:3]
    ln1b = vec_ref[3:4]
    ln2w = vec_ref[4:5]
    ln2b = vec_ref[5:6]

    # ---- multi-head self-attention ----
    q = jnp.dot(x2b, wq, preferred_element_type=jnp.float32)   # (N*S, E)
    k = jnp.dot(x2b, wk, preferred_element_type=jnp.float32)
    v = jnp.dot(x2b, wv, preferred_element_type=jnp.float32)

    q3 = q.reshape(N, S, E).astype(jnp.bfloat16)
    k3 = k.reshape(N, S, E).astype(jnp.bfloat16)
    v3 = v.reshape(N, S, E).astype(jnp.bfloat16)

    # Additive key mask, broadcast once (hoisted out of the head loop).
    bias = jnp.broadcast_to(bias_ref[...], (N, S, S))           # (N, S, S) f32

    inv_sqrt_d = jnp.float32(1.0 / (Dh ** 0.5))
    attn_out = jnp.zeros((NS, E), jnp.float32)
    for h in range(HEADS):
        sl = slice(h * Dh, (h + 1) * Dh)
        e = jnp.einsum('nqd,nkd->nqk', q3[:, :, sl], k3[:, :, sl],
                       preferred_element_type=jnp.float32) * inv_sqrt_d
        e = e + bias
        e = e - jnp.max(e, axis=-1, keepdims=True)
        p = jnp.exp(e)
        attn = p * pl.reciprocal(jnp.sum(p, axis=-1, keepdims=True), approx=True)
        ctx = jnp.einsum('nqk,nkd->nqd', attn.astype(jnp.bfloat16), v3[:, :, sl],
                         preferred_element_type=jnp.float32)    # (N, S, Dh)
        # Fold the head concat into the output projection.
        attn_out = attn_out + jnp.dot(
            ctx.reshape(NS, Dh).astype(jnp.bfloat16), wo[sl, :],
            preferred_element_type=jnp.float32)
    attn_out = attn_out + bo

    # norm1(attention + query)   (dropout == identity in eval)
    h1 = _layer_norm(attn_out + x2, ln1w, ln1b)

    # feed forward: Linear -> ReLU -> Linear
    ff = jnp.dot(h1.astype(jnp.bfloat16), w1, preferred_element_type=jnp.float32) + b1
    ff = jnp.maximum(ff, 0.0)
    ff = jnp.dot(ff.astype(jnp.bfloat16), w2, preferred_element_type=jnp.float32) + b2

    # norm2(forward + x)
    new_h = _layer_norm(ff + h1, ln2w, ln2b)
    hid_ref[...] = new_h

    @pl.when(layer == pl.num_programs(0) - 1)
    def _():
        out_ref[...] = new_h


# ---------------- wrapper: pack params, build mask bias, one pallas_call ----------------
def encoder_pallas(params, tokens, mask):
    N, S = tokens.shape
    E, FF, L = EMBED_SIZE, FF_DIM, NUM_LAYERS
    NS = N * S

    # Embedding glue (outside the kernel).
    positions = jnp.arange(S, dtype=jnp.int32)
    hid = params['word_emb'][tokens] + params['pos_emb'][positions][None, :, :]
    x2 = hid.reshape(NS, E).astype(jnp.float32)

    # Additive key-mask bias (0 = attend, -1e20 = masked key), computed once.
    bias = jnp.where(mask[:, None, :] == 0,
                     jnp.float32(-1e20), jnp.float32(0.0))       # (N, 1, S)

    # Pack per-layer params into a few stacked slabs.
    eye_h = jnp.eye(HEADS, dtype=jnp.float32)
    qkvo = jnp.stack([
        jnp.stack([jnp.kron(eye_h, p['wq']),
                   jnp.kron(eye_h, p['wk']),
                   jnp.kron(eye_h, p['wv']),
                   p['wo']], axis=0)
        for p in params['layers']], axis=0).astype(jnp.bfloat16)          # (L,4,E,E)
    w1 = jnp.stack([p['w1'] for p in params['layers']]).astype(jnp.bfloat16)  # (L,E,FF)
    w2 = jnp.stack([p['w2'] for p in params['layers']]).astype(jnp.bfloat16)  # (L,FF,E)
    b1 = jnp.stack([p['b1'] for p in params['layers']])                       # (L,1,FF)
    vec = jnp.stack([jnp.concatenate([p['bo'], p['b2'], p['ln1w'], p['ln1b'],
                                      p['ln2w'], p['ln2b']], axis=0)
                     for p in params['layers']])                              # (L,6,E)

    out2 = pl.pallas_call(
        encoder_kernel,
        out_shape=jax.ShapeDtypeStruct((NS, E), jnp.float32),
        grid=(L,),
        in_specs=[
            pl.BlockSpec((NS, E), lambda l: (0, 0)),              # x (embedded)
            pl.BlockSpec((N, 1, S), lambda l: (0, 0, 0)),         # mask bias
            pl.BlockSpec((None, 4, E, E), lambda l: (l, 0, 0, 0)),  # wq/wk/wv/wo
            pl.BlockSpec((None, E, FF), lambda l: (l, 0, 0)),     # w1
            pl.BlockSpec((None, 1, FF), lambda l: (l, 0, 0)),     # b1
            pl.BlockSpec((None, FF, E), lambda l: (l, 0, 0)),     # w2
            pl.BlockSpec((None, 6, E), lambda l: (l, 0, 0)),      # bo,b2,ln1w,ln1b,ln2w,ln2b
        ],
        out_specs=pl.BlockSpec((NS, E), lambda l: (0, 0)),
        scratch_shapes=[pltpu.VMEM((NS, E), jnp.float32)],        # resident hidden state
        compiler_params=pltpu.CompilerParams(
            dimension_semantics=("arbitrary",)),
    )(x2, bias, qkvo, w1, b1, w2, vec)

    return out2.reshape(N, S, E)


# ---------------- parameter init (deterministic, synthetic) ----------------
def init_encoder_params(key):
    k_word, k_pos, key = jax.random.split(key, 3)
    params = {
        'word_emb': 0.02 * jax.random.normal(k_word, (VOCAB, EMBED_SIZE), jnp.float32),
        'pos_emb': 0.02 * jax.random.normal(k_pos, (MAX_LEN, EMBED_SIZE), jnp.float32),
        'layers': [],
    }
    for _ in range(NUM_LAYERS):
        ks = jax.random.split(key, 8)
        key = ks[-1]
        layer = {
            'wq': 0.1 * jax.random.normal(ks[0], (DIM_HEAD, DIM_HEAD), jnp.float32),
            'wk': 0.1 * jax.random.normal(ks[1], (DIM_HEAD, DIM_HEAD), jnp.float32),
            'wv': 0.1 * jax.random.normal(ks[2], (DIM_HEAD, DIM_HEAD), jnp.float32),
            'wo': 0.1 * jax.random.normal(ks[3], (EMBED_SIZE, EMBED_SIZE), jnp.float32),
            'bo': 0.01 * jax.random.normal(ks[4], (1, EMBED_SIZE), jnp.float32),
            'ln1w': jnp.ones((1, EMBED_SIZE), jnp.float32),
            'ln1b': jnp.zeros((1, EMBED_SIZE), jnp.float32),
            'w1': 0.1 * jax.random.normal(ks[5], (EMBED_SIZE, FF_DIM), jnp.float32),
            'b1': jnp.zeros((1, FF_DIM), jnp.float32),
            'w2': 0.1 * jax.random.normal(ks[6], (FF_DIM, EMBED_SIZE), jnp.float32),
            'b2': jnp.zeros((1, EMBED_SIZE), jnp.float32),
            'ln2w': jnp.ones((1, EMBED_SIZE), jnp.float32),
            'ln2b': jnp.zeros((1, EMBED_SIZE), jnp.float32),
        }
        params['layers'].append(layer)
    return params


# ---------------- pure-JAX reference (f32, for the sanity check) ----------------
def ref_block(x, mask3, p):
    N, S, E = x.shape
    xh = x.reshape(N, S, HEADS, DIM_HEAD)
    q = jnp.einsum('nshd,de->nshe', xh, p['wq'])
    k = jnp.einsum('nshd,de->nshe', xh, p['wk'])
    v = jnp.einsum('nshd,de->nshe', xh, p['wv'])
    energy = jnp.einsum('nqhd,nkhd->nhqk', q, k) / (DIM_HEAD ** 0.5)
    energy = jnp.where(mask3.reshape(N, 1, 1, S) == 0.0, -1e20, energy)
    attn = jax.nn.softmax(energy, axis=-1)
    ctx = jnp.einsum('nhqv,nvhd->nqhd', attn, v).reshape(N, S, E)
    attn_out = ctx @ p['wo'] + p['bo'][0]
    h1 = _layer_norm(attn_out + x, p['ln1w'][0], p['ln1b'][0])
    ff = jnp.maximum(h1 @ p['w1'] + p['b1'][0], 0.0) @ p['w2'] + p['b2'][0]
    return _layer_norm(ff + h1, p['ln2w'][0], p['ln2b'][0])


def ref_encoder(params, tokens, mask):
    N, S = tokens.shape
    out = params['word_emb'][tokens] + params['pos_emb'][jnp.arange(S)][None, :, :]
    mask3 = mask.astype(jnp.float32).reshape(N, 1, S)
    for layer in params['layers']:
        out = ref_block(out, mask3, layer)
    return out


if __name__ == "__main__":
    key = jax.random.PRNGKey(0)
    k_tok, k_par = jax.random.split(key)

    tokens = jax.random.randint(k_tok, (BATCH, SEQ), 0, VOCAB, dtype=jnp.int32)
    # mask: 1 = attend, 0 = padded key; pad the tail of the second sequence.
    mask = jnp.ones((BATCH, SEQ), dtype=jnp.int32).at[1, -2:].set(0)

    params = init_encoder_params(k_par)

    out = jax.jit(encoder_pallas)(params, tokens, mask)
    out = jax.block_until_ready(out)

    ref = ref_encoder(params, tokens, mask)
    if not jnp.allclose(out, ref, atol=5e-2, rtol=5e-2):
        err = float(jnp.max(jnp.abs(out - ref)))
        raise AssertionError(f"Pallas encoder output mismatch vs reference (max abs err {err})")

    print("KERNEL_OK")
</pallas_src>

<mosaic_0001>
module attributes {stable_mosaic.version = 11 : i64} {
  func.func @encoder_kernel(%arg0: i32, %arg1: memref<16x32xf32, #tpu.memory_space<vmem>>, %arg2: memref<2x1x8xf32, #tpu.memory_space<vmem>>, %arg3: memref<1x4x32x32xbf16, #tpu.memory_space<vmem>>, %arg4: memref<1x32x128xbf16, #tpu.memory_space<vmem>>, %arg5: memref<1x1x128xf32, #tpu.memory_space<vmem>>, %arg6: memref<1x128x32xbf16, #tpu.memory_space<vmem>>, %arg7: memref<1x6x32xf32, #tpu.memory_space<vmem>>, %arg8: memref<16x32xf32, #tpu.memory_space<vmem>>, %arg9: memref<16x32xf32, #tpu.memory_space<vmem>>) attributes {dimension_semantics = [#tpu.dimension_semantics<arbitrary>], iteration_bounds = array<i64: 2>, scalar_prefetch = 0 : i64, scratch_operands = 1 : i64, tpu.core_type = #tpu.core_type<tc>, window_params = [{pipeline_mode = #tpu.pipeline_mode<synchronous>, transform_indices = @transform_0, window_bounds = array<i64: 16, 32>}, {pipeline_mode = #tpu.pipeline_mode<synchronous>, transform_indices = @transform_1, window_bounds = array<i64: 2, 1, 8>}, {transform_indices = @transform_2, window_bounds = array<i64: 1, 4, 32, 32>}, {transform_indices = @transform_3, window_bounds = array<i64: 1, 32, 128>}, {transform_indices = @transform_4, window_bounds = array<i64: 1, 1, 128>}, {transform_indices = @transform_5, window_bounds = array<i64: 1, 128, 32>}, {transform_indices = @transform_6, window_bounds = array<i64: 1, 6, 32>}, {pipeline_mode = #tpu.pipeline_mode<synchronous>, transform_indices = @transform_7, window_bounds = array<i64: 16, 32>}]} {
    %c0_i32 = arith.constant 0 : i32
    %0 = arith.cmpi eq, %arg0, %c0_i32 : i32
    %1 = arith.extui %0 : i1 to i32
    %c0_i32_0 = arith.constant 0 : i32
    %2 = arith.cmpi ne, %1, %c0_i32_0 : i32
    scf.if %2 {
      %c0_86 = arith.constant 0 : index
      %c0_87 = arith.constant 0 : index
      %202 = vector.load %arg1[%c0_86, %c0_87] : memref<16x32xf32, #tpu.memory_space<vmem>>, vector<16x32xf32>
      %c0_88 = arith.constant 0 : index
      %c0_89 = arith.constant 0 : index
      %203 = vector.load %arg9[%c0_88, %c0_89] : memref<16x32xf32, #tpu.memory_space<vmem>>, vector<16x32xf32>
      tpu.vector_store %arg9[%c0_88, %c0_89], %202 {strides = array<i32>} : memref<16x32xf32, #tpu.memory_space<vmem>>, vector<16x32xf32>,
    } else {
    }
    %c0 = arith.constant 0 : index
    %c0_1 = arith.constant 0 : index
    %3 = vector.load %arg9[%c0, %c0_1] : memref<16x32xf32, #tpu.memory_space<vmem>>, vector<16x32xf32>
    %4 = arith.truncf %3 : vector<16x32xf32> to vector<16x32xbf16>
    %c0_2 = arith.constant 0 : index
    %c0_3 = arith.constant 0 : index
    %c0_4 = arith.constant 0 : index
    %c0_5 = arith.constant 0 : index
    %5 = vector.load %arg3[%c0_2, %c0_3, %c0_4, %c0_5] : memref<1x4x32x32xbf16, #tpu.memory_space<vmem>>, vector<1x1x32x32xbf16>
    %6 = vector.shape_cast %5 : vector<1x1x32x32xbf16> to vector<32x32xbf16>
    %c0_6 = arith.constant 0 : index
    %c1 = arith.constant 1 : index
    %c0_7 = arith.constant 0 : index
    %c0_8 = arith.constant 0 : index
    %7 = vector.load %arg3[%c0_6, %c1, %c0_7, %c0_8] : memref<1x4x32x32xbf16, #tpu.memory_space<vmem>>, vector<1x1x32x32xbf16>
    %8 = vector.shape_cast %7 : vector<1x1x32x32xbf16> to vector<32x32xbf16>
    %c0_9 = arith.constant 0 : index
    %c2 = arith.constant 2 : index
    %c0_10 = arith.constant 0 : index
    %c0_11 = arith.constant 0 : index
    %9 = vector.load %arg3[%c0_9, %c2, %c0_10, %c0_11] : memref<1x4x32x32xbf16, #tpu.memory_space<vmem>>, vector<1x1x32x32xbf16>
    %10 = vector.shape_cast %9 : vector<1x1x32x32xbf16> to vector<32x32xbf16>
    %c0_12 = arith.constant 0 : index
    %c3 = arith.constant 3 : index
    %c0_13 = arith.constant 0 : index
    %c0_14 = arith.constant 0 : index
    %11 = vector.load %arg3[%c0_12, %c3, %c0_13, %c0_14] : memref<1x4x32x32xbf16, #tpu.memory_space<vmem>>, vector<1x1x32x32xbf16>
    %12 = vector.shape_cast %11 : vector<1x1x32x32xbf16> to vector<32x32xbf16>
    %c0_15 = arith.constant 0 : index
    %c0_16 = arith.constant 0 : index
    %c0_17 = arith.constant 0 : index
    %13 = vector.load %arg4[%c0_15, %c0_16, %c0_17] : memref<1x32x128xbf16, #tpu.memory_space<vmem>>, vector<1x32x128xbf16>
    %14 = vector.shape_cast %13 : vector<1x32x128xbf16> to vector<32x128xbf16>
    %c0_18 = arith.constant 0 : index
    %c0_19 = arith.constant 0 : index
    %c0_20 = arith.constant 0 : index
    %15 = vector.load %arg6[%c0_18, %c0_19, %c0_20] : memref<1x128x32xbf16, #tpu.memory_space<vmem>>, vector<1x128x32xbf16>
    %16 = vector.shape_cast %15 : vector<1x128x32xbf16> to vector<128x32xbf16>
    %c0_21 = arith.constant 0 : index
    %c0_22 = arith.constant 0 : index
    %c0_23 = arith.constant 0 : index
    %17 = vector.load %arg5[%c0_21, %c0_22, %c0_23] : memref<1x1x128xf32, #tpu.memory_space<vmem>>, vector<1x1x128xf32>
    %18 = vector.shape_cast %17 : vector<1x1x128xf32> to vector<1x128xf32>
    %c0_24 = arith.constant 0 : index
    %c0_25 = arith.constant 0 : index
    %c0_26 = arith.constant 0 : index
    %19 = vector.load %arg7[%c0_24, %c0_25, %c0_26] : memref<1x6x32xf32, #tpu.memory_space<vmem>>, vector<1x1x32xf32>
    %20 = vector.shape_cast %19 : vector<1x1x32xf32> to vector<1x32xf32>
    %c0_27 = arith.constant 0 : index
    %c1_28 = arith.constant 1 : index
    %c0_29 = arith.constant 0 : index
    %21 = vector.load %arg7[%c0_27, %c1_28, %c0_29] : memref<1x6x32xf32, #tpu.memory_space<vmem>>, vector<1x1x32xf32>
    %22 = vector.shape_cast %21 : vector<1x1x32xf32> to vector<1x32xf32>
    %c0_30 = arith.constant 0 : index
    %c2_31 = arith.constant 2 : index
    %c0_32 = arith.constant 0 : index
    %23 = vector.load %arg7[%c0_30, %c2_31, %c0_32] : memref<1x6x32xf32, #tpu.memory_space<vmem>>, vector<1x1x32xf32>
    %24 = vector.shape_cast %23 : vector<1x1x32xf32> to vector<1x32xf32>
    %c0_33 = arith.constant 0 : index
    %c3_34 = arith.constant 3 : index
    %c0_35 = arith.constant 0 : index
    %25 = vector.load %arg7[%c0_33, %c3_34, %c0_35] : memref<1x6x32xf32, #tpu.memory_space<vmem>>, vector<1x1x32xf32>
    %26 = vector.shape_cast %25 : vector<1x1x32xf32> to vector<1x32xf32>
    %c0_36 = arith.constant 0 : index
    %c4 = arith.constant 4 : index
    %c0_37 = arith.constant 0 : index
    %27 = vector.load %arg7[%c0_36, %c4, %c0_37] : memref<1x6x32xf32, #tpu.memory_space<vmem>>, vector<1x1x32xf32>
    %28 = vector.shape_cast %27 : vector<1x1x32xf32> to vector<1x32xf32>
    %c0_38 = arith.constant 0 : index
    %c5 = arith.constant 5 : index
    %c0_39 = arith.constant 0 : index
    %29 = vector.load %arg7[%c0_38, %c5, %c0_39] : memref<1x6x32xf32, #tpu.memory_space<vmem>>, vector<1x1x32xf32>
    %30 = vector.shape_cast %29 : vector<1x1x32xf32> to vector<1x32xf32>
    %cst = arith.constant dense<0.000000e+00> : vector<16x32xf32>
    %31 = tpu.matmul %4, %6, %cst {dimension_numbers = #tpu.dot_dimension_numbers<[1], [0], [0], [1], [0, 0, 1, 1], [], []>} : vector<16x32xbf16>, vector<32x32xbf16>, vector<16x32xf32> -> vector<16x32xf32>
    %cst_40 = arith.constant dense<0.000000e+00> : vector<16x32xf32>
    %32 = tpu.matmul %4, %8, %cst_40 {dimension_numbers = #tpu.dot_dimension_numbers<[1], [0], [0], [1], [0, 0, 1, 1], [], []>} : vector<16x32xbf16>, vector<32x32xbf16>, vector<16x32xf32> -> vector<16x32xf32>
    %cst_41 = arith.constant dense<0.000000e+00> : vector<16x32xf32>
    %33 = tpu.matmul %4, %10, %cst_41 {dimension_numbers = #tpu.dot_dimension_numbers<[1], [0], [0], [1], [0, 0, 1, 1], [], []>} : vector<16x32xbf16>, vector<32x32xbf16>, vector<16x32xf32> -> vector<16x32xf32>
    %34 = vector.shape_cast %31 : vector<16x32xf32> to vector<2x8x32xf32>
    %35 = arith.truncf %34 : vector<2x8x32xf32> to vector<2x8x32xbf16>
    %36 = vector.shape_cast %32 : vector<16x32xf32> to vector<2x8x32xf32>
    %37 = arith.truncf %36 : vector<2x8x32xf32> to vector<2x8x32xbf16>
    %38 = vector.shape_cast %33 : vector<16x32xf32> to vector<2x8x32xf32>
    %39 = arith.truncf %38 : vector<2x8x32xf32> to vector<2x8x32xbf16>
    %c0_42 = arith.constant 0 : index
    %c0_43 = arith.constant 0 : index
    %c0_44 = arith.constant 0 : index
    %40 = vector.load %arg2[%c0_42, %c0_43, %c0_44] : memref<2x1x8xf32, #tpu.memory_space<vmem>>, vector<2x1x8xf32>
    %41 = vector.shape_cast %40 : vector<2x1x8xf32> to vector<2x1x8xf32>
    %42 = vector.broadcast %41 : vector<2x1x8xf32> to vector<2x8x8xf32>
    %cst_45 = arith.constant 0.000000e+00 : f32
    %43 = vector.broadcast %cst_45 : f32 to vector<16x32xf32>
    %44 = vector.extract_strided_slice %35 {offsets = [0, 0, 0], sizes = [2, 8, 8], strides = [1, 1, 1]} : vector<2x8x32xbf16> to vector<2x8x8xbf16>
    %45 = vector.extract_strided_slice %37 {offsets = [0, 0, 0], sizes = [2, 8, 8], strides = [1, 1, 1]} : vector<2x8x32xbf16> to vector<2x8x8xbf16>
    "tpu.trace_start"() <{level = 10 : i32, message = "nqd,nkd->nqk"}> : () -> ()
    %cst_46 = arith.constant dense<0.000000e+00> : vector<2x8x8xf32>
    %46 = tpu.matmul %44, %45, %cst_46 {dimension_numbers = #tpu.dot_dimension_numbers<[2], [2], [1], [1], [0, 0, 0, 1, 1, 1], [0], [0]>} : vector<2x8x8xbf16>, vector<2x8x8xbf16>, vector<2x8x8xf32> -> vector<2x8x8xf32>
    "tpu.trace_stop"() : () -> ()
    %cst_47 = arith.constant 0.353553385 : f32
    %47 = vector.broadcast %cst_47 : f32 to vector<2x8x8xf32>
    %48 = arith.mulf %46, %47 : vector<2x8x8xf32>
    %49 = arith.addf %48, %42 : vector<2x8x8xf32>
    %cst_48 = arith.constant dense<0xFF800000> : vector<2x8xf32>
    %50 = vector.multi_reduction <maximumf>, %49, %cst_48 [2] : vector<2x8x8xf32> to vector<2x8xf32>
    %51 = vector.shape_cast %50 : vector<2x8xf32> to vector<2x8x1xf32>
    %52 = vector.broadcast %51 : vector<2x8x1xf32> to vector<2x8x8xf32>
    %53 = arith.subf %49, %52 : vector<2x8x8xf32>
    %54 = math.exp %53 : vector<2x8x8xf32>
    %cst_49 = arith.constant dense<0.000000e+00> : vector<2x8xf32>
    %55 = vector.multi_reduction <add>, %54, %cst_49 [2] : vector<2x8x8xf32> to vector<2x8xf32>
    %56 = vector.shape_cast %55 : vector<2x8xf32> to vector<2x8x1xf32>
    %57 = tpu.reciprocal %56 {approx = true} : vector<2x8x1xf32> -> vector<2x8x1xf32>
    %58 = vector.broadcast %57 : vector<2x8x1xf32> to vector<2x8x8xf32>
    %59 = arith.mulf %54, %58 : vector<2x8x8xf32>
    %60 = arith.truncf %59 : vector<2x8x8xf32> to vector<2x8x8xbf16>
    %61 = vector.extract_strided_slice %39 {offsets = [0, 0, 0], sizes = [2, 8, 8], strides = [1, 1, 1]} : vector<2x8x32xbf16> to vector<2x8x8xbf16>
    "tpu.trace_start"() <{level = 10 : i32, message = "nqk,nkd->nqd"}> : () -> ()
    %cst_50 = arith.constant dense<0.000000e+00> : vector<2x8x8xf32>
    %62 = tpu.matmul %60, %61, %cst_50 {dimension_numbers = #tpu.dot_dimension_numbers<[2], [1], [1], [2], [0, 0, 0, 1, 1, 2], [0], [0]>} : vector<2x8x8xbf16>, vector<2x8x8xbf16>, vector<2x8x8xf32> -> vector<2x8x8xf32>
    "tpu.trace_stop"() : () -> ()
    %63 = vector.shape_cast %62 : vector<2x8x8xf32> to vector<16x8xf32>
    %64 = arith.truncf %63 : vector<16x8xf32> to vector<16x8xbf16>
    %65 = vector.extract_strided_slice %12 {offsets = [0, 0], sizes = [8, 32], strides = [1, 1]} : vector<32x32xbf16> to vector<8x32xbf16>
    %cst_51 = arith.constant dense<0.000000e+00> : vector<16x32xf32>
    %66 = tpu.matmul %64, %65, %cst_51 {dimension_numbers = #tpu.dot_dimension_numbers<[1], [0], [0], [1], [0, 0, 1, 1], [], []>} : vector<16x8xbf16>, vector<8x32xbf16>, vector<16x32xf32> -> vector<16x32xf32>
    %67 = arith.addf %43, %66 : vector<16x32xf32>
    %68 = vector.extract_strided_slice %35 {offsets = [0, 0, 8], sizes = [2, 8, 8], strides = [1, 1, 1]} : vector<2x8x32xbf16> to vector<2x8x8xbf16>
    %69 = vector.extract_strided_slice %37 {offsets = [0, 0, 8], sizes = [2, 8, 8], strides = [1, 1, 1]} : vector<2x8x32xbf16> to vector<2x8x8xbf16>
    "tpu.trace_start"() <{level = 10 : i32, message = "nqd,nkd->nqk"}> : () -> ()
    %cst_52 = arith.constant dense<0.000000e+00> : vector<2x8x8xf32>
    %70 = tpu.matmul %68, %69, %cst_52 {dimension_numbers = #tpu.dot_dimension_numbers<[2], [2], [1], [1], [0, 0, 0, 1, 1, 1], [0], [0]>} : vector<2x8x8xbf16>, vector<2x8x8xbf16>, vector<2x8x8xf32> -> vector<2x8x8xf32>
    "tpu.trace_stop"() : () -> ()
    %cst_53 = arith.constant 0.353553385 : f32
    %71 = vector.broadcast %cst_53 : f32 to vector<2x8x8xf32>
    %72 = arith.mulf %70, %71 : vector<2x8x8xf32>
    %73 = arith.addf %72, %42 : vector<2x8x8xf32>
    %cst_54 = arith.constant dense<0xFF800000> : vector<2x8xf32>
    %74 = vector.multi_reduction <maximumf>, %73, %cst_54 [2] : vector<2x8x8xf32> to vector<2x8xf32>
    %75 = vector.shape_cast %74 : vector<2x8xf32> to vector<2x8x1xf32>
    %76 = vector.broadcast %75 : vector<2x8x1xf32> to vector<2x8x8xf32>
    %77 = arith.subf %73, %76 : vector<2x8x8xf32>
    %78 = math.exp %77 : vector<2x8x8xf32>
    %cst_55 = arith.constant dense<0.000000e+00> : vector<2x8xf32>
    %79 = vector.multi_reduction <add>, %78, %cst_55 [2] : vector<2x8x8xf32> to vector<2x8xf32>
    %80 = vector.shape_cast %79 : vector<2x8xf32> to vector<2x8x1xf32>
    %81 = tpu.reciprocal %80 {approx = true} : vector<2x8x1xf32> -> vector<2x8x1xf32>
    %82 = vector.broadcast %81 : vector<2x8x1xf32> to vector<2x8x8xf32>
    %83 = arith.mulf %78, %82 : vector<2x8x8xf32>
    %84 = arith.truncf %83 : vector<2x8x8xf32> to vector<2x8x8xbf16>
    %85 = vector.extract_strided_slice %39 {offsets = [0, 0, 8], sizes = [2, 8, 8], strides = [1, 1, 1]} : vector<2x8x32xbf16> to vector<2x8x8xbf16>
    "tpu.trace_start"() <{level = 10 : i32, message = "nqk,nkd->nqd"}> : () -> ()
    %cst_56 = arith.constant dense<0.000000e+00> : vector<2x8x8xf32>
    %86 = tpu.matmul %84, %85, %cst_56 {dimension_numbers = #tpu.dot_dimension_numbers<[2], [1], [1], [2], [0, 0, 0, 1, 1, 2], [0], [0]>} : vector<2x8x8xbf16>, vector<2x8x8xbf16>, vector<2x8x8xf32> -> vector<2x8x8xf32>
    "tpu.trace_stop"() : () -> ()
    %87 = vector.shape_cast %86 : vector<2x8x8xf32> to vector<16x8xf32>
    %88 = arith.truncf %87 : vector<16x8xf32> to vector<16x8xbf16>
    %89 = vector.extract_strided_slice %12 {offsets = [8, 0], sizes = [8, 32], strides = [1, 1]} : vector<32x32xbf16> to vector<8x32xbf16>
    %cst_57 = arith.constant dense<0.000000e+00> : vector<16x32xf32>
    %90 = tpu.matmul %88, %89, %cst_57 {dimension_numbers = #tpu.dot_dimension_numbers<[1], [0], [0], [1], [0, 0, 1, 1], [], []>} : vector<16x8xbf16>, vector<8x32xbf16>, vector<16x32xf32> -> vector<16x32xf32>
    %91 = arith.addf %67, %90 : vector<16x32xf32>
    %92 = vector.extract_strided_slice %35 {offsets = [0, 0, 16], sizes = [2, 8, 8], strides = [1, 1, 1]} : vector<2x8x32xbf16> to vector<2x8x8xbf16>
    %93 = vector.extract_strided_slice %37 {offsets = [0, 0, 16], sizes = [2, 8, 8], strides = [1, 1, 1]} : vector<2x8x32xbf16> to vector<2x8x8xbf16>
    "tpu.trace_start"() <{level = 10 : i32, message = "nqd,nkd->nqk"}> : () -> ()
    %cst_58 = arith.constant dense<0.000000e+00> : vector<2x8x8xf32>
    %94 = tpu.matmul %92, %93, %cst_58 {dimension_numbers = #tpu.dot_dimension_numbers<[2], [2], [1], [1], [0, 0, 0, 1, 1, 1], [0], [0]>} : vector<2x8x8xbf16>, vector<2x8x8xbf16>, vector<2x8x8xf32> -> vector<2x8x8xf32>
    "tpu.trace_stop"() : () -> ()
    %cst_59 = arith.constant 0.353553385 : f32
    %95 = vector.broadcast %cst_59 : f32 to vector<2x8x8xf32>
    %96 = arith.mulf %94, %95 : vector<2x8x8xf32>
    %97 = arith.addf %96, %42 : vector<2x8x8xf32>
    %cst_60 = arith.constant dense<0xFF800000> : vector<2x8xf32>
    %98 = vector.multi_reduction <maximumf>, %97, %cst_60 [2] : vector<2x8x8xf32> to vector<2x8xf32>
    %99 = vector.shape_cast %98 : vector<2x8xf32> to vector<2x8x1xf32>
    %100 = vector.broadcast %99 : vector<2x8x1xf32> to vector<2x8x8xf32>
    %101 = arith.subf %97, %100 : vector<2x8x8xf32>
    %102 = math.exp %101 : vector<2x8x8xf32>
    %cst_61 = arith.constant dense<0.000000e+00> : vector<2x8xf32>
    %103 = vector.multi_reduction <add>, %102, %cst_61 [2] : vector<2x8x8xf32> to vector<2x8xf32>
    %104 = vector.shape_cast %103 : vector<2x8xf32> to vector<2x8x1xf32>
    %105 = tpu.reciprocal %104 {approx = true} : vector<2x8x1xf32> -> vector<2x8x1xf32>
    %106 = vector.broadcast %105 : vector<2x8x1xf32> to vector<2x8x8xf32>
    %107 = arith.mulf %102, %106 : vector<2x8x8xf32>
    %108 = arith.truncf %107 : vector<2x8x8xf32> to vector<2x8x8xbf16>
    %109 = vector.extract_strided_slice %39 {offsets = [0, 0, 16], sizes = [2, 8, 8], strides = [1, 1, 1]} : vector<2x8x32xbf16> to vector<2x8x8xbf16>
    "tpu.trace_start"() <{level = 10 : i32, message = "nqk,nkd->nqd"}> : () -> ()
    %cst_62 = arith.constant dense<0.000000e+00> : vector<2x8x8xf32>
    %110 = tpu.matmul %108, %109, %cst_62 {dimension_numbers = #tpu.dot_dimension_numbers<[2], [1], [1], [2], [0, 0, 0, 1, 1, 2], [0], [0]>} : vector<2x8x8xbf16>, vector<2x8x8xbf16>, vector<2x8x8xf32> -> vector<2x8x8xf32>
    "tpu.trace_stop"() : () -> ()
    %111 = vector.shape_cast %110 : vector<2x8x8xf32> to vector<16x8xf32>
    %112 = arith.truncf %111 : vector<16x8xf32> to vector<16x8xbf16>
    %113 = vector.extract_strided_slice %12 {offsets = [16, 0], sizes = [8, 32], strides = [1, 1]} : vector<32x32xbf16> to vector<8x32xbf16>
    %cst_63 = arith.constant dense<0.000000e+00> : vector<16x32xf32>
    %114 = tpu.matmul %112, %113, %cst_63 {dimension_numbers = #tpu.dot_dimension_numbers<[1], [0], [0], [1], [0, 0, 1, 1], [], []>} : vector<16x8xbf16>, vector<8x32xbf16>, vector<16x32xf32> -> vector<16x32xf32>
    %115 = arith.addf %91, %114 : vector<16x32xf32>
    %116 = vector.extract_strided_slice %35 {offsets = [0, 0, 24], sizes = [2, 8, 8], strides = [1, 1, 1]} : vector<2x8x32xbf16> to vector<2x8x8xbf16>
    %117 = vector.extract_strided_slice %37 {offsets = [0, 0, 24], sizes = [2, 8, 8], strides = [1, 1, 1]} : vector<2x8x32xbf16> to vector<2x8x8xbf16>
    "tpu.trace_start"() <{level = 10 : i32, message = "nqd,nkd->nqk"}> : () -> ()
    %cst_64 = arith.constant dense<0.000000e+00> : vector<2x8x8xf32>
    %118 = tpu.matmul %116, %117, %cst_64 {dimension_numbers = #tpu.dot_dimension_numbers<[2], [2], [1], [1], [0, 0, 0, 1, 1, 1], [0], [0]>} : vector<2x8x8xbf16>, vector<2x8x8xbf16>, vector<2x8x8xf32> -> vector<2x8x8xf32>
    "tpu.trace_stop"() : () -> ()
    %cst_65 = arith.constant 0.353553385 : f32
    %119 = vector.broadcast %cst_65 : f32 to vector<2x8x8xf32>
    %120 = arith.mulf %118, %119 : vector<2x8x8xf32>
    %121 = arith.addf %120, %42 : vector<2x8x8xf32>
    %cst_66 = arith.constant dense<0xFF800000> : vector<2x8xf32>
    %122 = vector.multi_reduction <maximumf>, %121, %cst_66 [2] : vector<2x8x8xf32> to vector<2x8xf32>
    %123 = vector.shape_cast %122 : vector<2x8xf32> to vector<2x8x1xf32>
    %124 = vector.broadcast %123 : vector<2x8x1xf32> to vector<2x8x8xf32>
    %125 = arith.subf %121, %124 : vector<2x8x8xf32>
    %126 = math.exp %125 : vector<2x8x8xf32>
    %cst_67 = arith.constant dense<0.000000e+00> : vector<2x8xf32>
    %127 = vector.multi_reduction <add>, %126, %cst_67 [2] : vector<2x8x8xf32> to vector<2x8xf32>
    %128 = vector.shape_cast %127 : vector<2x8xf32> to vector<2x8x1xf32>
    %129 = tpu.reciprocal %128 {approx = true} : vector<2x8x1xf32> -> vector<2x8x1xf32>
    %130 = vector.broadcast %129 : vector<2x8x1xf32> to vector<2x8x8xf32>
    %131 = arith.mulf %126, %130 : vector<2x8x8xf32>
    %132 = arith.truncf %131 : vector<2x8x8xf32> to vector<2x8x8xbf16>
    %133 = vector.extract_strided_slice %39 {offsets = [0, 0, 24], sizes = [2, 8, 8], strides = [1, 1, 1]} : vector<2x8x32xbf16> to vector<2x8x8xbf16>
    "tpu.trace_start"() <{level = 10 : i32, message = "nqk,nkd->nqd"}> : () -> ()
    %cst_68 = arith.constant dense<0.000000e+00> : vector<2x8x8xf32>
    %134 = tpu.matmul %132, %133, %cst_68 {dimension_numbers = #tpu.dot_dimension_numbers<[2], [1], [1], [2], [0, 0, 0, 1, 1, 2], [0], [0]>} : vector<2x8x8xbf16>, vector<2x8x8xbf16>, vector<2x8x8xf32> -> vector<2x8x8xf32>
    "tpu.trace_stop"() : () -> ()
    %135 = vector.shape_cast %134 : vector<2x8x8xf32> to vector<16x8xf32>
    %136 = arith.truncf %135 : vector<16x8xf32> to vector<16x8xbf16>
    %137 = vector.extract_strided_slice %12 {offsets = [24, 0], sizes = [8, 32], strides = [1, 1]} : vector<32x32xbf16> to vector<8x32xbf16>
    %cst_69 = arith.constant dense<0.000000e+00> : vector<16x32xf32>
    %138 = tpu.matmul %136, %137, %cst_69 {dimension_numbers = #tpu.dot_dimension_numbers<[1], [0], [0], [1], [0, 0, 1, 1], [], []>} : vector<16x8xbf16>, vector<8x32xbf16>, vector<16x32xf32> -> vector<16x32xf32>
    %139 = arith.addf %115, %138 : vector<16x32xf32>
    %140 = vector.broadcast %20 : vector<1x32xf32> to vector<16x32xf32>
    %141 = arith.addf %139, %140 : vector<16x32xf32>
    %142 = arith.addf %141, %3 : vector<16x32xf32>
    %cst_70 = arith.constant dense<0.000000e+00> : vector<16xf32>
    %143 = vector.multi_reduction <add>, %142, %cst_70 [1] : vector<16x32xf32> to vector<16xf32>
    %144 = vector.shape_cast %143 : vector<16xf32> to vector<16x1xf32>
    %cst_71 = arith.constant 3.200000e+01 : f32
    %145 = vector.broadcast %cst_71 : f32 to vector<16x1xf32>
    %146 = arith.divf %144, %145 : vector<16x1xf32>
    %147 = vector.broadcast %146 : vector<16x1xf32> to vector<16x32xf32>
    %148 = arith.subf %142, %147 : vector<16x32xf32>
    %149 = arith.mulf %148, %148 : vector<16x32xf32>
    %cst_72 = arith.constant dense<0.000000e+00> : vector<16xf32>
    %150 = vector.multi_reduction <add>, %149, %cst_72 [1] : vector<16x32xf32> to vector<16xf32>
    %151 = vector.shape_cast %150 : vector<16xf32> to vector<16x1xf32>
    %cst_73 = arith.constant 3.200000e+01 : f32
    %152 = vector.broadcast %cst_73 : f32 to vector<16x1xf32>
    %153 = arith.divf %151, %152 : vector<16x1xf32>
    %154 = vector.broadcast %146 : vector<16x1xf32> to vector<16x32xf32>
    %155 = arith.subf %142, %154 : vector<16x32xf32>
    %cst_74 = arith.constant 9.99999974E-6 : f32
    %156 = vector.broadcast %cst_74 : f32 to vector<16x1xf32>
    %157 = arith.addf %153, %156 : vector<16x1xf32>
    %158 = math.rsqrt %157 : vector<16x1xf32>
    %159 = vector.broadcast %158 : vector<16x1xf32> to vector<16x32xf32>
    %160 = arith.mulf %155, %159 : vector<16x32xf32>
    %161 = vector.broadcast %24 : vector<1x32xf32> to vector<16x32xf32>
    %162 = arith.mulf %160, %161 : vector<16x32xf32>
    %163 = vector.broadcast %26 : vector<1x32xf32> to vector<16x32xf32>
    %164 = arith.addf %162, %163 : vector<16x32xf32>
    %165 = arith.truncf %164 : vector<16x32xf32> to vector<16x32xbf16>
    %cst_75 = arith.constant dense<0.000000e+00> : vector<16x128xf32>
    %166 = tpu.matmul %165, %14, %cst_75 {dimension_numbers = #tpu.dot_dimension_numbers<[1], [0], [0], [1], [0, 0, 1, 1], [], []>} : vector<16x32xbf16>, vector<32x128xbf16>, vector<16x128xf32> -> vector<16x128xf32>
    %167 = vector.broadcast %18 : vector<1x128xf32> to vector<16x128xf32>
    %168 = arith.addf %166, %167 : vector<16x128xf32>
    %cst_76 = arith.constant 0.000000e+00 : f32
    %169 = vector.broadcast %cst_76 : f32 to vector<16x128xf32>
    %170 = arith.maximumf %168, %169 : vector<16x128xf32>
    %171 = arith.truncf %170 : vector<16x128xf32> to vector<16x128xbf16>
    %cst_77 = arith.constant dense<0.000000e+00> : vector<16x32xf32>
    %172 = tpu.matmul %171, %16, %cst_77 {dimension_numbers = #tpu.dot_dimension_numbers<[1], [0], [0], [1], [0, 0, 1, 1], [], []>} : vector<16x128xbf16>, vector<128x32xbf16>, vector<16x32xf32> -> vector<16x32xf32>
    %173 = vector.broadcast %22 : vector<1x32xf32> to vector<16x32xf32>
    %174 = arith.addf %172, %173 : vector<16x32xf32>
    %175 = arith.addf %174, %164 : vector<16x32xf32>
    %cst_78 = arith.constant dense<0.000000e+00> : vector<16xf32>
    %176 = vector.multi_reduction <add>, %175, %cst_78 [1] : vector<16x32xf32> to vector<16xf32>
    %177 = vector.shape_cast %176 : vector<16xf32> to vector<16x1xf32>
    %cst_79 = arith.constant 3.200000e+01 : f32
    %178 = vector.broadcast %cst_79 : f32 to vector<16x1xf32>
    %179 = arith.divf %177, %178 : vector<16x1xf32>
    %180 = vector.broadcast %179 : vector<16x1xf32> to vector<16x32xf32>
    %181 = arith.subf %175, %180 : vector<16x32xf32>
    %182 = arith.mulf %181, %181 : vector<16x32xf32>
    %cst_80 = arith.constant dense<0.000000e+00> : vector<16xf32>
    %183 = vector.multi_reduction <add>, %182, %cst_80 [1] : vector<16x32xf32> to vector<16xf32>
    %184 = vector.shape_cast %183 : vector<16xf32> to vector<16x1xf32>
    %cst_81 = arith.constant 3.200000e+01 : f32
    %185 = vector.broadcast %cst_81 : f32 to vector<16x1xf32>
    %186 = arith.divf %184, %185 : vector<16x1xf32>
    %187 = vector.broadcast %179 : vector<16x1xf32> to vector<16x32xf32>
    %188 = arith.subf %175, %187 : vector<16x32xf32>
    %cst_82 = arith.constant 9.99999974E-6 : f32
    %189 = vector.broadcast %cst_82 : f32 to vector<16x1xf32>
    %190 = arith.addf %186, %189 : vector<16x1xf32>
    %191 = math.rsqrt %190 : vector<16x1xf32>
    %192 = vector.broadcast %191 : vector<16x1xf32> to vector<16x32xf32>
    %193 = arith.mulf %188, %192 : vector<16x32xf32>
    %194 = vector.broadcast %28 : vector<1x32xf32> to vector<16x32xf32>
    %195 = arith.mulf %193, %194 : vector<16x32xf32>
    %196 = vector.broadcast %30 : vector<1x32xf32> to vector<16x32xf32>
    %197 = arith.addf %195, %196 : vector<16x32xf32>
    %c0_83 = arith.constant 0 : index
    %c0_84 = arith.constant 0 : index
    %198 = vector.load %arg9[%c0_83, %c0_84] : memref<16x32xf32, #tpu.memory_space<vmem>>, vector<16x32xf32>
    tpu.vector_store %arg9[%c0_83, %c0_84], %197 {strides = array<i32>} : memref<16x32xf32, #tpu.memory_space<vmem>>, vector<16x32xf32>,
    %c1_i32 = arith.constant 1 : i32
    %199 = arith.cmpi eq, %arg0, %c1_i32 : i32
    %200 = arith.extui %199 : i1 to i32
    %c0_i32_85 = arith.constant 0 : i32
    %201 = arith.cmpi ne, %200, %c0_i32_85 : i32
    scf.if %201 {
      %c0_86 = arith.constant 0 : index
      %c0_87 = arith.constant 0 : index
      %202 = vector.load %arg8[%c0_86, %c0_87] : memref<16x32xf32, #tpu.memory_space<vmem>>, vector<16x32xf32>
      tpu.vector_store %arg8[%c0_86, %c0_87], %197 {strides = array<i32>} : memref<16x32xf32, #tpu.memory_space<vmem>>, vector<16x32xf32>,
    } else {
    }
    return
  }
  func.func @transform_0(%arg0: i32) -> (i32, i32) {
    %c0_i32 = arith.constant 0 : i32
    %c0_i32_0 = arith.constant 0 : i32
    %c0_i32_1 = arith.constant 0 : i32
    return %c0_i32, %c0_i32_0 : i32, i32
  }
  func.func @transform_1(%arg0: i32) -> (i32, i32, i32) {
    %c0_i32 = arith.constant 0 : i32
    %c0_i32_0 = arith.constant 0 : i32
    %c0_i32_1 = arith.constant 0 : i32
    %c0_i32_2 = arith.constant 0 : i32
    return %c0_i32, %c0_i32_0, %c0_i32_1 : i32, i32, i32
  }
  func.func @transform_2(%arg0: i32) -> (i32, i32, i32, i32) {
    %c0_i32 = arith.constant 0 : i32
    %c0_i32_0 = arith.constant 0 : i32
    %c0_i32_1 = arith.constant 0 : i32
    %c0_i32_2 = arith.constant 0 : i32
    return %arg0, %c0_i32, %c0_i32_0, %c0_i32_1 : i32, i32, i32, i32
  }
  func.func @transform_3(%arg0: i32) -> (i32, i32, i32) {
    %c0_i32 = arith.constant 0 : i32
    %c0_i32_0 = arith.constant 0 : i32
    %c0_i32_1 = arith.constant 0 : i32
    return %arg0, %c0_i32, %c0_i32_0 : i32, i32, i32
  }
  func.func @transform_4(%arg0: i32) -> (i32, i32, i32) {
    %c0_i32 = arith.constant 0 : i32
    %c0_i32_0 = arith.constant 0 : i32
    %c0_i32_1 = arith.constant 0 : i32
    return %arg0, %c0_i32, %c0_i32_0 : i32, i32, i32
  }
  func.func @transform_5(%arg0: i32) -> (i32, i32, i32) {
    %c0_i32 = arith.constant 0 : i32
    %c0_i32_0 = arith.constant 0 : i32
    %c0_i32_1 = arith.constant 0 : i32
    return %arg0, %c0_i32, %c0_i32_0 : i32, i32, i32
  }
  func.func @transform_6(%arg0: i32) -> (i32, i32, i32) {
    %c0_i32 = arith.constant 0 : i32
    %c0_i32_0 = arith.constant 0 : i32
    %c0_i32_1 = arith.constant 0 : i32
    return %arg0, %c0_i32, %c0_i32_0 : i32, i32, i32
  }
  func.func @transform_7(%arg0: i32) -> (i32, i32) {
    %c0_i32 = arith.constant 0 : i32
    %c0_i32_0 = arith.constant 0 : i32
    %c0_i32_1 = arith.constant 0 : i32
    return %c0_i32, %c0_i32_0 : i32, i32
  }
}

</mosaic_0001>

<bundles_post_ra>
// kernel: encoder_pallas.1
= control target key start
LH: loop header
LB: loop body
LE: loop exit
PB: predicated region body
PF: predicated region fallthrough
CT: control target
= control target key end

     0   :  { %12 = vsyncpa [#allocation4], 0  ;;  %s2491_s24 = smov 0   ;;  %s2850_s0 = inlined_call_operand.vmem [shape: f32[16,32], index: 0, kind: input, shape index: {}]   ;;  %s2851_s1 = inlined_call_operand.vmem [shape: f32[2,1,8], index: 1, kind: input, shape index: {}]   ;;  %s2852_s2 = inlined_call_operand.vmem [shape: bf16[2,4,32,32], index: 2, kind: input, shape index: {}]   ;;  %s2853_s3 = inlined_call_operand.vmem [shape: bf16[2,32,128], index: 3, kind: input, shape index: {}]   ;;  %s2854_s4 = inlined_call_operand.vmem [shape: f32[2,1,128], index: 4, kind: input, shape index: {}]   ;;  %s2855_s5 = inlined_call_operand.vmem [shape: bf16[2,128,32], index: 5, kind: input, shape index: {}]   ;;  %s2856_s6 = inlined_call_operand.vmem [shape: f32[2,6,32], index: 6, kind: input, shape index: {}]   ;;  %s2857_s7 = inlined_call_operand.hbm [shape: f32[16,32], index: 7, kind: output, shape index: {}]  }
   0x1 LB: > { %s2497_s25 = sadd.s32 4294967295, %s2441_s24   ;;  %p2016_p0 = scmp.ge.s32.totalorder %s2441_s24, 1  ;;  %s2441_s24 = sphi %s2491_s24, %s18_s24  }
   0x2   : > { %p270_p1 = scmp.lt.s32.totalorder %s2441_s24, 3 }
   0x4   : > { %p271_p2 = pnand %p2016_p0, %p270_p1 }
   0x5   : > { %p314_p3 = scmp.lt.s32.totalorder (!%p271_p2), %s2497_s25, 1  ;;  %p2024_p4 = scmp.ne.s32.totalorder (!%p271_p2), %s2497_s25, 0 }
   0x6   : > { %274 = sbr.rel (%p271_p2) target bundleno = 4371 (0x1113), region = 48 }
   0xd   : > { %s2503_s26 = scalar_select %p314_p3, %s2497_s25, 1 }
   0xe   : > { %340 = sbr.rel (%p2024_p4) target bundleno = 21 (0x15), region = 52  ;;  %v341_v0 = vld [vmem:[%s2850_s0] sm:$0xff] (!%p2024_p4)  ;;  %vm343_vm0 = vcmask (!%p2024_p4), 261120   ;;  %v342_v1 = vld [vmem:[%s2850_s0 + $0x8] sm:$0xff] (!%p2024_p4) }
   0xf   : > { %s2091_s27 = sshll.u32 %s2503_s26, 6  ;;  %s2092_s28 = sshll.u32 %s2503_s26, 4  ;;  %344 = vst.msk [vmem:[#allocation2] sm:$0xff] (!%p2024_p4), %vm343_vm0, %v341_v0  ;;  %345 = vst.msk [vmem:[#allocation2 + $0x8] sm:$0xff] (!%p2024_p4), %vm343_vm0, %v342_v1 }
  0x10   : > { %s2510_s8 = scalar_lea.vmem %s2852_s2, %s2091_s27  ;;  %s2515_s11 = scalar_lea.vmem %s2853_s3, %s2092_s28 }
  0x11   : > { %s326_s14 = scalar_lea.vmem %s2854_s4, %s2503_s26  ;;  %s2524_s17 = scalar_lea.vmem %s2855_s5, %s2091_s27 }
  0x12   : > { %s2023_s18 = sshll.u32 %s2503_s26, 3 }
  0x13   : > { %s2530_s21 = scalar_lea.vmem %s2856_s6, %s2023_s18 }
  0x15 PF: > { %v2349_v2 = vld [vmem:[%s2510_s8] sm:$0xff]   ;;  %v2443_v3 = vmov 0.0   ;;  %v2350_v4 = vld [vmem:[%s2510_s8 + $0x8] sm:$0xff]   ;;  %vm2444_vm1 = vmmov 0   ;;  %vm407_vm2 = vcmask 261120   ;;  %v2351_v8 = vld [vmem:[%s2510_s8 + $0x10] sm:$0xff]  }
  0x16   : > { %2155 = vmatprep.subr.bf16.mxu1 %v2443_v3  ;;  %2185 = vmatprep.subr.bf16.mxu0 %v2443_v3  ;;  %v2545_v5 = vld [vmem:[#allocation2] sm:$0xff]  ;;  %v2547_v6 = vld [vmem:[#allocation2 + $0x8] sm:$0xff]  ;;  %v2352_v9 = vld [vmem:[%s2510_s8 + $0x18] sm:$0xff]   ;;  %vm578_vm3 = vcmask 64512   ;;  %s2445_s27 = smov 120   ;;  %vm702_vm4 = vcmask 1043456  }
  0x17   : > { %2156 = vmatpush3.bf16.msra.mxu1 %v2349_v2  ;;  %2159 = vmatprep.mubr.msk.bf16.mxu1 %vm2444_vm1, %v2443_v3  ;;  %v348_v7 = vpack.c.bf16 %v2547_v6, %v2545_v5  ;;  %v2353_v10 = vld [vmem:[%s2510_s8 + $0x20] sm:$0xff]   ;;  %v2354_v11 = vld [vmem:[%s2510_s8 + $0x28] sm:$0xff]   ;;  %s2446_s13 = smov 112   ;;  %s2447_s15 = smov 104  }
  0x18   : > { %2157 = vmatprep.subr.bf16.mxu1 %v2443_v3  ;;  %2187 = vmatprep.mubr.msk.bf16.mxu0 %vm2444_vm1, %v2443_v3  ;;  %v2609_v35 = vld [vmem:[%s2851_s1] ss:$0 sm:$0xff]  ;;  %v2614_v40 = vld [vmem:[%s2851_s1 + $0x1] ss:$0 sm:$0xff]  ;;  %p2086_p5 = scmp.ne.s32.totalorder %s2497_s25, 1 }
  0x1b   : > { %2158 = vmatpush3.bf16.msra.mxu1 %v2350_v4 }
  0x1c   : > { %2163 = vmatprep.subr.bf16.mxu1 %v2443_v3 }
  0x1e   : > { %2160 = vmatmul.mubr.msk.bf16.vlgmr.msra.gmra.mrb[0].mxu1 %vm407_vm2, %v348_v7 }
  0x1f   : > { %2164 = vmatpush3.bf16.msra.mxu1 %v2351_v8  ;;  %2167 = vmatprep.mubr.msk.bf16.mxu1 %vm2444_vm1, %v2443_v3 }
  0x20   : > { %2165 = vmatprep.subr.bf16.mxu1 %v2443_v3 }
  0x23   : > { %2166 = vmatpush3.bf16.msra.mxu1 %v2352_v9 }
  0x24   : > { %2171 = vmatprep.subr.bf16.mxu1 %v2443_v3 }
  0x26   : > { %2168 = vmatmul.mubr.msk.bf16.vlgmr.msra.gmra.mrb[4].mxu1 %vm407_vm2, %v348_v7 }
  0x27   : > { %2172 = vmatpush3.bf16.msra.mxu1 %v2353_v10  ;;  %2175 = vmatprep.mubr.msk.bf16.mxu1 %vm2444_vm1, %v2443_v3 }
  0x28   : > { %2173 = vmatprep.subr.bf16.mxu1 %v2443_v3 }
  0x2b   : > { %2174 = vmatpush3.bf16.msra.mxu1 %v2354_v11 }
  0x2c   : > { %2179 = vmatprep.subr.bf16.mxu1 %v2443_v3 }
  0x2e   : > { %2176 = vmatmul.mubr.msk.bf16.vlgmr.msra.gmra.mrb[8].mxu1 %vm407_vm2, %v348_v7 }
  0x2f   : > { %2181 = vmatprep.mubr.msk.bf16.mxu1 %vm2444_vm1, %v2443_v3 }
  0xf1   : > { %v445_v12 = vpop.f32.mrb[0].mxu1 }
  0xf2   : > { %v2161_v13 = vpop.f32.mrb[1].mxu1  ;;  %v2584_v24 = vpack.c.bf16 %v445_v12, %v445_v12 }
  0xf3   : > { %v448_v14 = vpop.f32.mrb[2].mxu1 }
  0xf4   : > { %v2162_v15 = vpop.f32.mrb[3].mxu1  ;;  %v2586_v25 = vpack.c.bf16 %v448_v14, %v448_v14 }
  0xf9   : > { %v498_v16 = vpop.f32.mrb[4].mxu1 }
  0xfa   : > { %v2572_v17 = vpack.c.bf16 %v498_v16, %v498_v16  ;;  %v2169_v18 = vpop.f32.mrb[5].mxu1 }
  0xfb   : > { %v501_v19 = vpop.f32.mrb[6].mxu1 }
  0xfc   : > { %v2574_v20 = vpack.c.bf16 %v501_v19, %v501_v19  ;;  %v2170_v21 = vpop.f32.mrb[7].mxu1  ;;  %v583_v22 = vsel %vm578_vm3, %v2572_v17, 0 }
  0xfd   : > { %2180 = vmatpush3.bf16.xpose.msra.mxu1 %v583_v22 }
  0xfe   : > { %849 = vrot.lane.b32.xlu1 %v2574_v20, %s2445_s27  ;;  %v629_v23 = vsel %vm578_vm3, %v2574_v20, 0  ;;  %2191 = vmatprep.subr.bf16.mxu1 %v2443_v3 }
  0xff   : > { %2186 = vmatpush3.bf16.xpose.msra.mxu0 %v629_v23 }
 0x100   : > { %2197 = vmatprep.subr.bf16.mxu0 %v2443_v3 }
 0x101   : > { %v551_v26 = vpop.f32.mrb[8].mxu1 }
 0x102   : > { %v2596_v27 = vpack.c.bf16 %v551_v26, %v551_v26  ;;  %v2177_v28 = vpop.f32.mrb[9].mxu1 }
 0x103   : > { %v554_v29 = vpop.f32.mrb[10].mxu1 }
 0x104   : > { %2182 = vmatmul.mubr.msk.bf16.vlgmr.msra.gmra.mrb[12].mxu1 %vm578_vm3, %v2584_v24  ;;  %v2598_v30 = vpack.c.bf16 %v554_v29, %v554_v29  ;;  %v2178_v31 = vpop.f32.mrb[11].mxu1  ;;  %v704_v32 = vsel %vm702_vm4, %v2596_v27, 0 }
 0x105   : > { %2193 = vmatprep.mubr.msk.bf16.mxu1 %vm2444_vm1, %v2443_v3  ;;  %2192 = vmatpush3.bf16.msra.mxu1 %v704_v32 }
 0x106   : > { %2188 = vmatmul.mubr.msk.bf16.vlgmr.msra.gmra.mrb[0].mxu0 %vm578_vm3, %v2586_v25  ;;  %v750_v33 = vsel %vm702_vm4, %v2598_v30, 0  ;;  %2203 = vmatprep.subr.bf16.mxu1 %v2443_v3 }
 0x107   : > { %2199 = vmatprep.mubr.msk.bf16.mxu0 %vm2444_vm1, %v2443_v3  ;;  %2198 = vmatpush3.bf16.msra.mxu0 %v750_v33 }
 0x108   : > { %2209 = vmatprep.subr.bf16.mxu0 %v2443_v3 }
 0x170   : > { %v850_v60 = vpop.permute.xlu1 %849 }
 0x171   : > { %v855_v10 = vsel %vm578_vm3, %v850_v60, 0 }
 0x1d7   : > { %v619_v34 = vpop.f32.mrb[12].mxu1 }
 0x1d8   : > { %v671_v36 = vmul.f32 0.35355338, %v619_v34  ;;  %v2183_v37 = vpop.f32.mrb[13].mxu1 }
 0x1d9   : > { %v622_v38 = vpop.f32.mrb[14].mxu1  ;;  %v665_v39 = vpop.f32.mrb[0].mxu0 }
 0x1da   : > { %v672_v41 = vmul.f32 0.35355338, %v665_v39  ;;  %v2184_v42 = vpop.f32.mrb[15].mxu1  ;;  %v2189_v43 = vpop.f32.mrb[1].mxu0  ;;  %v673_v44 = vadd.f32 %v2609_v35, %v671_v36 }
 0x1db   : > { %v668_v45 = vpop.f32.mrb[2].mxu0 }
 0x1dc   : > { %v2190_v46 = vpop.f32.mrb[3].mxu0  ;;  %v675_v47 = vsel %vm578_vm3, %v673_v44, -inf  ;;  %v674_v48 = vadd.f32 %v2614_v40, %v672_v41 }
 0x1dd   : > { %676 = vmax.xlane.f32.xlu0 %v675_v47 }
 0x1de   : > { %v678_v49 = vsel %vm578_vm3, %v674_v48, -inf }
 0x1e1   : > { %679 = vmax.xlane.f32.xlu0 %v678_v49 }
 0x1f7   : > { %797 = vrot.lane.b32.xlu0 %v2572_v17, %s2445_s27 }
 0x26a   : > { %v677_v50 = vpop.xlane.xlu0 %676 }
 0x26b   : > { %v681_v51 = vsub.f32 %v673_v44, %v677_v50 }
 0x26d   : > { %v683_v52 = vmul.f32 1.442695, %v681_v51 }
 0x26e   : > { %v680_v53 = vpop.xlane.xlu0 %679 }
 0x26f   : > { %2365 = vpow2.f32 %v683_v52  ;;  %v682_v54 = vsub.f32 %v674_v48, %v680_v53 }
 0x271   : > { %v685_v55 = vmul.f32 1.442695, %v682_v54 }
 0x272   : > { %v798_v1 = vpop.permute.xlu0 %797 }
 0x273   : > { %2367 = vpow2.f32 %v685_v55  ;;  %v803_v7 = vsel %vm578_vm3, %v798_v1, 0 }
 0x279   : > { %v2366_v56 = vpop.eup %2365 }
 0x27a   : > { %v687_v57 = vsel %vm578_vm3, %v2366_v56, 0.0 }
 0x27b   : > { %688 = vadd.xlane.f32.xlu1 %v687_v57 }
 0x27d   : > { %v2368_v58 = vpop.eup %2367 }
 0x27e   : > { %v690_v59 = vsel %vm578_vm3, %v2368_v58, 0.0 }
 0x27f   : > { %691 = vadd.xlane.f32.xlu1 %v690_v59 }
 0x290   : > { %794 = vrot.lane.b32.xlu1 %v2584_v24, %s2445_s27 }
 0x294   : > { %846 = vrot.lane.b32.xlu1 %v2586_v25, %s2445_s27 }
 0x308   : > { %v689_v61 = vpop.xlane.xlu1 %688 }
 0x309   : > { %2369 = vrcp.f32 %v689_v61  ;;  %v2034_v61 = vld [vmem:[%s2510_s8 + $0x34] sm:$0xf] }
 0x30c   : > { %v692_v62 = vpop.xlane.xlu1 %691 }
 0x30d   : > { %2371 = vrcp.f32 %v692_v62 }
 0x310   : > { %v795_v11 = vpop.permute.xlu1 %794 }
 0x313   : > { %v2370_v63 = vpop.eup %2369 }
 0x314   : > { %v695_v0 = vmul.f32 %v2370_v63, %v2366_v56  ;;  %v847_v12 = vpop.permute.xlu1 %846 }
 0x316   : > { %v697_v2 = vpack.c.bf16 %v695_v0, %v695_v0  ;;  %v1028_v0 = vsel %vm702_vm4, %v2034_v61, 0 }
 0x317   : > { %v2372_v4 = vpop.eup %2371 }
 0x318   : > { %v696_v8 = vmul.f32 %v2372_v4, %v2368_v58  ;;  %2194 = vmatmul.mubr.msk.bf16.vlgmr.msra.gmra.mrb[16].mxu1 %vm578_vm3, %v697_v2  ;;  %v2033_v2 = vld [vmem:[%s2510_s8 + $0x30] sm:$0xf] }
 0x319   : > { %2204 = vmatpush3.bf16.xpose.msra.mxu1 %v803_v7  ;;  %2205 = vmatprep.mubr.msk.bf16.mxu1 %vm2444_vm1, %v2443_v3 }
 0x31a   : > { %v698_v9 = vpack.c.bf16 %v696_v8, %v696_v8  ;;  %2215 = vmatprep.subr.bf16.mxu1 %v2443_v3  ;;  %v1075_v8 = vsel %vm702_vm4, %v2033_v2, 0 }
 0x31c   : > { %2200 = vmatmul.mubr.msk.bf16.vlgmr.msra.gmra.mrb[4].mxu0 %vm578_vm3, %v698_v9 }
 0x31d   : > { %2210 = vmatpush3.bf16.xpose.msra.mxu0 %v855_v10  ;;  %2211 = vmatprep.mubr.msk.bf16.mxu0 %vm2444_vm1, %v2443_v3 }
 0x31e   : > { %2221 = vmatprep.subr.bf16.mxu0 %v2443_v3 }
 0x320   : > { %2206 = vmatmul.mubr.msk.bf16.vlgmr.msra.gmra.mrb[20].mxu1 %vm578_vm3, %v795_v11 }
 0x321   : > { %2217 = vmatprep.mubr.msk.bf16.mxu1 %vm2444_vm1, %v2443_v3 }
 0x324   : > { %2212 = vmatmul.mubr.msk.bf16.vlgmr.msra.gmra.mrb[8].mxu0 %vm578_vm3, %v847_v12 }
 0x325   : > { %2223 = vmatprep.mubr.msk.bf16.mxu0 %vm2444_vm1, %v2443_v3 }
 0x3eb   : > { %v2644_v13 = vpop.f32.mrb[16].mxu1 }
 0x3ec   : > { %v2195_v14 = vpop.f32.mrb[17].mxu1 }
 0x3ed   : > { %v743_v15 = vpop.f32.mrb[18].mxu1 }
 0x3ee   : > { %v2196_v16 = vpop.f32.mrb[19].mxu1 }
 0x3ef   : > { %v2646_v18 = vpop.f32.mrb[4].mxu0 }
 0x3f0   : > { %v792_v19 = vpack.c.bf16 %v2646_v18, %v2644_v13  ;;  %v2201_v21 = vpop.f32.mrb[5].mxu0 }
 0x3f1   : > { %v789_v22 = vpop.f32.mrb[6].mxu0 }
 0x3f2   : > { %v2202_v23 = vpop.f32.mrb[7].mxu0 }
 0x3f3   : > { %v839_v26 = vpop.f32.mrb[20].mxu1 }
 0x3f4   : > { %v897_v28 = vmul.f32 0.35355338, %v839_v26  ;;  %v2207_v29 = vpop.f32.mrb[21].mxu1 }
 0x3f5   : > { %v842_v31 = vpop.f32.mrb[22].mxu1 }
 0x3f6   : > { %v2208_v32 = vpop.f32.mrb[23].mxu1  ;;  %v899_v33 = vadd.f32 %v2609_v35, %v897_v28 }
 0x3f7   : > { %v891_v34 = vpop.f32.mrb[8].mxu0 }
 0x3f8   : > { %v898_v36 = vmul.f32 0.35355338, %v891_v34  ;;  %v2213_v37 = vpop.f32.mrb[9].mxu0  ;;  %v901_v38 = vsel %vm578_vm3, %v899_v33, -inf }
 0x3f9   : > { %v894_v39 = vpop.f32.mrb[10].mxu0  ;;  %902 = vmax.xlane.f32.xlu0 %v901_v38 }
 0x3fa   : > { %v2214_v41 = vpop.f32.mrb[11].mxu0  ;;  %v900_v42 = vadd.f32 %v2614_v40, %v898_v36 }
 0x3fc   : > { %v904_v43 = vsel %vm578_vm3, %v900_v42, -inf }
 0x3fd   : > { %905 = vmax.xlane.f32.xlu1 %v904_v43 }
 0x40e   : > { %975 = vrot.lane.b32.xlu1 %v2598_v30, %s2445_s27 }
 0x412   : > { %1120 = vrot.lane.b32.xlu1 %v2572_v17, %s2446_s13 }
 0x416   : > { %1170 = vrot.lane.b32.xlu1 %v2574_v20, %s2446_s13 }
 0x41a   : > { %1168 = vrot.lane.b32.xlu1 %v2586_v25, %s2446_s13 }
 0x486   : > { %v903_v44 = vpop.xlane.xlu0 %902 }
 0x487   : > { %v907_v45 = vsub.f32 %v899_v33, %v903_v44 }
 0x489   : > { %v909_v46 = vmul.f32 1.442695, %v907_v45 }
 0x48a   : > { %v906_v47 = vpop.xlane.xlu1 %905 }
 0x48b   : > { %2373 = vpow2.f32 %v909_v46  ;;  %v908_v48 = vsub.f32 %v900_v42, %v906_v47 }
 0x48d   : > { %v911_v49 = vmul.f32 1.442695, %v908_v48 }
 0x48e   : > { %v976_v50 = vpop.permute.xlu1 %975 }
 0x48f   : > { %2375 = vpow2.f32 %v911_v49  ;;  %v981_v51 = vsel %vm702_vm4, %v976_v50, 0 }
 0x490   : > { %2222 = vmatpush3.bf16.msra.mxu0 %v981_v51 }
 0x491   : > { %2233 = vmatprep.subr.bf16.mxu0 %v2443_v3 }
 0x492   : > { %v1121_v9 = vpop.permute.xlu1 %1120 }
 0x493   : > { %v1126_v23 = vsel %vm578_vm3, %v1121_v9, 0 }
 0x495   : > { %v2374_v52 = vpop.eup %2373 }
 0x496   : > { %v913_v53 = vsel %vm578_vm3, %v2374_v52, 0.0  ;;  %v1171_v10 = vpop.permute.xlu1 %1170 }
 0x497   : > { %914 = vadd.xlane.f32.xlu0 %v913_v53  ;;  %v1176_v11 = vsel %vm578_vm3, %v1171_v10, 0 }
 0x499   : > { %v2376_v54 = vpop.eup %2375 }
 0x49a   : > { %v916_v55 = vsel %vm578_vm3, %v2376_v54, 0.0  ;;  %v1169_v12 = vpop.permute.xlu1 %1168 }
 0x49b   : > { %917 = vadd.xlane.f32.xlu0 %v916_v55 }
 0x4b1   : > { %926 = vrot.lane.b32.xlu0 %v2596_v27, %s2445_s27 }
 0x4b5   : > { %1118 = vrot.lane.b32.xlu0 %v2584_v24, %s2446_s13 }
 0x524   : > { %v915_v56 = vpop.xlane.xlu0 %914 }
 0x525   : > { %2377 = vrcp.f32 %v915_v56 }
 0x528   : > { %v918_v57 = vpop.xlane.xlu0 %917 }
 0x529   : > { %2379 = vrcp.f32 %v918_v57 }
 0x52c   : > { %v927_v58 = vpop.permute.xlu0 %926 }
 0x52d   : > { %v932_v59 = vsel %vm702_vm4, %v927_v58, 0 }
 0x52e   : > { %2216 = vmatpush3.bf16.msra.mxu1 %v932_v59 }
 0x52f   : > { %v2378_v60 = vpop.eup %2377  ;;  %2227 = vmatprep.subr.bf16.mxu1 %v2443_v3 }
 0x530   : > { %v921_v62 = vmul.f32 %v2378_v60, %v2374_v52  ;;  %v1119_v31 = vpop.permute.xlu0 %1118 }
 0x532   : > { %v923_v63 = vpack.c.bf16 %v921_v62, %v921_v62 }
 0x533   : > { %v2380_v1 = vpop.eup %2379 }
 0x534   : > { %v922_v4 = vmul.f32 %v2380_v1, %v2376_v54  ;;  %2218 = vmatmul.mubr.msk.bf16.vlgmr.msra.gmra.mrb[24].mxu1 %vm578_vm3, %v923_v63 }
 0x535   : > { %2228 = vmatpush3.bf16.msra.mxu1 %v1028_v0  ;;  %2229 = vmatprep.mubr.msk.bf16.mxu1 %vm2444_vm1, %v2443_v3 }
 0x536   : > { %v924_v7 = vpack.c.bf16 %v922_v4, %v922_v4  ;;  %2239 = vmatprep.subr.bf16.mxu1 %v2443_v3 }
 0x538   : > { %2224 = vmatmul.mubr.msk.bf16.vlgmr.msra.gmra.mrb[12].mxu0 %vm578_vm3, %v924_v7 }
 0x539   : > { %2234 = vmatpush3.bf16.msra.mxu0 %v1075_v8  ;;  %2235 = vmatprep.mubr.msk.bf16.mxu0 %vm2444_vm1, %v2443_v3 }
 0x53a   : > { %2245 = vmatprep.subr.bf16.mxu0 %v2443_v3 }
 0x540   : > { %2236 = vmatmul.mubr.msk.bf16.vlgmr.msra.gmra.mrb[16].mxu0 %vm578_vm3, %v792_v19 }
 0x541   : > { %2247 = vmatprep.mubr.msk.bf16.mxu0 %vm2444_vm1, %v2443_v3 }
 0x542   : > { %2246 = vmatpush3.bf16.xpose.msra.mxu0 %v1176_v11 }
 0x543   : > { %2257 = vmatprep.subr.bf16.mxu0 %v2443_v3 }
 0x549   : > { %2248 = vmatmul.mubr.msk.bf16.vlgmr.msra.gmra.mrb[20].mxu0 %vm578_vm3, %v1169_v12 }
 0x54a   : > { %2259 = vmatprep.mubr.msk.bf16.mxu0 %vm2444_vm1, %v2443_v3 }
 0x607   : > { %v968_v14 = vpop.f32.mrb[24].mxu1 }
 0x608   : > { %v2219_v15 = vpop.f32.mrb[25].mxu1 }
 0x609   : > { %v971_v16 = vpop.f32.mrb[26].mxu1 }
 0x60a   : > { %v2220_v13 = vpop.f32.mrb[27].mxu1 }
 0x60b   : > { %v1017_v18 = vpop.f32.mrb[12].mxu0 }
 0x60c   : > { %v1023_v19 = vpack.c.bf16 %v1017_v18, %v968_v14  ;;  %v2225_v21 = vpop.f32.mrb[13].mxu0 }
 0x60d   : > { %v1020_v22 = vpop.f32.mrb[14].mxu0 }
 0x60e   : > { %v2226_v26 = vpop.f32.mrb[15].mxu0  ;;  %2230 = vmatmul.mubr.msk.bf16.vlgmr.msra.gmra.mrb[28].mxu1 %vm578_vm3, %v1023_v19  ;;  %v2035_v22 = vld [vmem:[%s2510_s8 + $0x38] sm:$0xf] }
 0x60f   : > { %2240 = vmatpush3.bf16.xpose.msra.mxu1 %v1126_v23  ;;  %2241 = vmatprep.mubr.msk.bf16.mxu1 %vm2444_vm1, %v2443_v3  ;;  %v1347_v23 = vsel %vm702_vm4, %v2035_v22, 0 }
 0x610   : > { %2251 = vmatprep.subr.bf16.mxu1 %v2443_v3 }
 0x613   : > { %v1111_v28 = vpop.f32.mrb[16].mxu0 }
 0x614   : > { %v2237_v29 = vpop.f32.mrb[17].mxu0 }
 0x615   : > { %v1114_v32 = vpop.f32.mrb[18].mxu0 }
 0x616   : > { %v2238_v33 = vpop.f32.mrb[19].mxu0  ;;  %2242 = vmatmul.mubr.msk.bf16.vlgmr.msra.gmra.mrb[32].mxu1 %vm578_vm3, %v1119_v31 }
 0x617   : > { %2253 = vmatprep.mubr.msk.bf16.mxu1 %vm2444_vm1, %v2443_v3 }
 0x61c   : > { %v1212_v34 = vpop.f32.mrb[20].mxu0 }
 0x61d   : > { %v1219_v36 = vmul.f32 0.35355338, %v1212_v34  ;;  %v2249_v37 = vpop.f32.mrb[21].mxu0 }
 0x61e   : > { %v1215_v38 = vpop.f32.mrb[22].mxu0 }
 0x61f   : > { %v2250_v39 = vpop.f32.mrb[23].mxu0  ;;  %v1221_v41 = vadd.f32 %v2614_v40, %v1219_v36 }
 0x621   : > { %v1225_v42 = vsel %vm578_vm3, %v1221_v41, -inf }
 0x622   : > { %1226 = vmax.xlane.f32.xlu1 %v1225_v42 }
 0x633   : > { %1294 = vrot.lane.b32.xlu1 %v2598_v30, %s2446_s13 }
 0x637   : > { %1394 = vrot.lane.b32.xlu1 %v2572_v17, %s2447_s15 }
 0x63b   : > { %1444 = vrot.lane.b32.xlu1 %v2574_v20, %s2447_s15 }
 0x63f   : > { %1442 = vrot.lane.b32.xlu1 %v2586_v25, %s2447_s15 }
 0x6af   : > { %v1227_v43 = vpop.xlane.xlu1 %1226 }
 0x6b0   : > { %v1229_v46 = vsub.f32 %v1221_v41, %v1227_v43 }
 0x6b2   : > { %v1232_v47 = vmul.f32 1.442695, %v1229_v46 }
 0x6b3   : > { %v1295_v44 = vpop.permute.xlu1 %1294 }
 0x6b4   : > { %v1300_v45 = vsel %vm702_vm4, %v1295_v44, 0  ;;  %2381 = vpow2.f32 %v1232_v47 }
 0x6b5   : > { %2258 = vmatpush3.bf16.msra.mxu0 %v1300_v45 }
 0x6b6   : > { %2269 = vmatprep.subr.bf16.mxu0 %v2443_v3 }
 0x6b7   : > { %v1395_v7 = vpop.permute.xlu1 %1394 }
 0x6b8   : > { %v1400_v9 = vsel %vm578_vm3, %v1395_v7, 0 }
 0x6bb   : > { %v1445_v36 = vpop.permute.xlu1 %1444 }
 0x6bc   : > { %v1450_v42 = vsel %vm578_vm3, %v1445_v36, 0 }
 0x6be   : > { %v2382_v58 = vpop.eup %2381 }
 0x6bf   : > { %v1237_v59 = vsel %vm578_vm3, %v2382_v58, 0.0 }
 0x6e1   : > { %v1064_v48 = vpop.f32.mrb[28].mxu1 }
 0x6e2   : > { %v2715_v49 = vadd.f32 %v1111_v28, %v1064_v48  ;;  %v2231_v50 = vpop.f32.mrb[29].mxu1 }
 0x6e3   : > { %v1067_v17 = vpop.f32.mrb[30].mxu1 }
 0x6e4   : > { %v2717_v51 = vadd.f32 %v1114_v32, %v1067_v17  ;;  %v2232_v20 = vpop.f32.mrb[31].mxu1 }
 0x6e9   : > { %v1162_v52 = vpop.f32.mrb[32].mxu1 }
 0x6ea   : > { %v1218_v25 = vmul.f32 0.35355338, %v1162_v52  ;;  %v2243_v53 = vpop.f32.mrb[33].mxu1 }
 0x6eb   : > { %v1165_v54 = vpop.f32.mrb[34].mxu1 }
 0x6ec   : > { %v2244_v55 = vpop.f32.mrb[35].mxu1  ;;  %v1220_v56 = vadd.f32 %v2609_v35, %v1218_v25 }
 0x6ee   : > { %v1222_v57 = vsel %vm578_vm3, %v1220_v56, -inf }
 0x6ef   : > { %1223 = vmax.xlane.f32.xlu0 %v1222_v57 }
 0x6f3   : > { %1238 = vadd.xlane.f32.xlu0 %v1237_v59 }
 0x77c   : > { %v1224_v60 = vpop.xlane.xlu0 %1223 }
 0x77d   : > { %v1228_v61 = vsub.f32 %v1220_v56, %v1224_v60 }
 0x77f   : > { %v1230_v62 = vmul.f32 1.442695, %v1228_v61 }
 0x780   : > { %v1239_v63 = vpop.xlane.xlu0 %1238 }
 0x781   : > { %2383 = vpow2.f32 %v1230_v62 }
 0x782   : > { %2385 = vrcp.f32 %v1239_v63 }
 0x78b   : > { %v2384_v0 = vpop.eup %2383 }
 0x78c   : > { %v2386_v1 = vpop.eup %2385  ;;  %v1234_v2 = vsel %vm578_vm3, %v2384_v0, 0.0 }
 0x78d   : > { %v1243_v4 = vmul.f32 %v2386_v1, %v2382_v58  ;;  %1235 = vadd.xlane.f32.xlu0 %v1234_v2 }
 0x78f   : > { %v1245_v8 = vpack.c.bf16 %v1243_v4, %v1243_v4 }
 0x791   : > { %2260 = vmatmul.mubr.msk.bf16.vlgmr.msra.gmra.mrb[24].mxu0 %vm578_vm3, %v1245_v8 }
 0x792   : > { %2270 = vmatpush3.bf16.xpose.msra.mxu0 %v1400_v9  ;;  %2271 = vmatprep.mubr.msk.bf16.mxu0 %vm2444_vm1, %v2443_v3 }
 0x793   : > { %2281 = vmatprep.subr.bf16.mxu0 %v2443_v3 }
 0x7a3   : > { %1246 = vrot.lane.b32.xlu0 %v2596_v27, %s2446_s13 }
 0x7a7   : > { %1392 = vrot.lane.b32.xlu0 %v2584_v24, %s2447_s15 }
 0x81a   : > { %v1236_v10 = vpop.xlane.xlu0 %1235 }
 0x81b   : > { %2387 = vrcp.f32 %v1236_v10 }
 0x81e   : > { %v1247_v11 = vpop.permute.xlu0 %1246 }
 0x81f   : > { %v1252_v12 = vsel %vm702_vm4, %v1247_v11, 0 }
 0x820   : > { %2252 = vmatpush3.bf16.msra.mxu1 %v1252_v12  ;;  %v2036_v12 = vld [vmem:[%s2510_s8 + $0x3c] sm:$0xf] }
 0x821   : > { %2263 = vmatprep.subr.bf16.mxu1 %v2443_v3 }
 0x822   : > { %v1393_v14 = vpop.permute.xlu0 %1392 }
 0x823   : > { %2272 = vmatmul.mubr.msk.bf16.vlgmr.msra.gmra.mrb[28].mxu0 %vm578_vm3, %v1393_v14  ;;  %v1621_v14 = vsel %vm702_vm4, %v2036_v12, 0 }
 0x824   : > { %2283 = vmatprep.mubr.msk.bf16.mxu0 %vm2444_vm1, %v2443_v3 }
 0x825   : > { %v2388_v15 = vpop.eup %2387 }
 0x826   : > { %v1242_v16 = vmul.f32 %v2388_v15, %v2384_v0 }
 0x828   : > { %v1244_v13 = vpack.c.bf16 %v1242_v16, %v1242_v16 }
 0x82a   : > { %2254 = vmatmul.mubr.msk.bf16.vlgmr.msra.gmra.mrb[36].mxu1 %vm578_vm3, %v1244_v13 }
 0x82b   : > { %2265 = vmatprep.mubr.msk.bf16.mxu1 %vm2444_vm1, %v2443_v3  ;;  %2264 = vmatpush3.bf16.msra.mxu1 %v1347_v23 }
 0x82c   : > { %2275 = vmatprep.subr.bf16.mxu1 %v2443_v3 }
 0x864   : > { %v1336_v24 = vpop.f32.mrb[24].mxu0 }
 0x865   : > { %v2261_v18 = vpop.f32.mrb[25].mxu0 }
 0x866   : > { %v1339_v19 = vpop.f32.mrb[26].mxu0 }
 0x867   : > { %v2262_v21 = vpop.f32.mrb[27].mxu0 }
 0x8f6   : > { %v1436_v26 = vpop.f32.mrb[28].mxu0 }
 0x8f7   : > { %v1492_v28 = vmul.f32 0.35355338, %v1436_v26  ;;  %v2273_v29 = vpop.f32.mrb[29].mxu0  ;;  %v2068_v26 = vld [vmem:[%s2530_s21] ss:$0 sm:$0xff] }
 0x8f8   : > { %v1439_v31 = vpop.f32.mrb[30].mxu0 }
 0x8f9   : > { %v2274_v32 = vpop.f32.mrb[31].mxu0  ;;  %v1494_v33 = vadd.f32 %v2609_v35, %v1492_v28  ;;  %v1443_v35 = vpop.permute.xlu1 %1442 }
 0x8fb   : > { %v1496_v34 = vsel %vm578_vm3, %v1494_v33, -inf }
 0x8fc   : > { %1497 = vmax.xlane.f32.xlu0 %v1496_v34 }
 0x8fd   : > { %v1288_v37 = vpop.f32.mrb[36].mxu1 }
 0x8fe   : > { %v1342_v38 = vpack.c.bf16 %v1336_v24, %v1288_v37  ;;  %v2255_v39 = vpop.f32.mrb[37].mxu1 }
 0x8ff   : > { %v1291_v41 = vpop.f32.mrb[38].mxu1 }
 0x900   : > { %v2256_v43 = vpop.f32.mrb[39].mxu1  ;;  %2266 = vmatmul.mubr.msk.bf16.vlgmr.msra.gmra.mrb[40].mxu1 %vm578_vm3, %v1342_v38 }
 0x901   : > { %2276 = vmatpush3.bf16.xpose.msra.mxu1 %v1450_v42  ;;  %2277 = vmatprep.mubr.msk.bf16.mxu1 %vm2444_vm1, %v2443_v3 }
 0x902   : > { %2287 = vmatprep.subr.bf16.mxu1 %v2443_v3 }
 0x908   : > { %2278 = vmatmul.mubr.msk.bf16.vlgmr.msra.gmra.mrb[44].mxu1 %vm578_vm3, %v1443_v35 }
 0x909   : > { %2289 = vmatprep.mubr.msk.bf16.mxu1 %vm2444_vm1, %v2443_v3 }
 0x989   : > { %v1498_v44 = vpop.xlane.xlu0 %1497 }
 0x98a   : > { %v1502_v45 = vsub.f32 %v1494_v33, %v1498_v44 }
 0x98c   : > { %v1504_v46 = vmul.f32 1.442695, %v1502_v45 }
 0x98e   : > { %2389 = vpow2.f32 %v1504_v46 }
 0x998   : > { %v2390_v47 = vpop.eup %2389 }
 0x999   : > { %v1508_v48 = vsel %vm578_vm3, %v2390_v47, 0.0 }
 0x99a   : > { %1509 = vadd.xlane.f32.xlu0 %v1508_v48 }
 0x9d3   : > { %v1383_v50 = vpop.f32.mrb[40].mxu1 }
 0x9d4   : > { %v1390_v17 = vadd.f32 %v1383_v50, %v2715_v49  ;;  %v2267_v20 = vpop.f32.mrb[41].mxu1 }
 0x9d5   : > { %v1386_v52 = vpop.f32.mrb[42].mxu1  ;;  %v2356_v20 = vld [vmem:[%s2515_s11 + $0x8] sm:$0xff]  }
 0x9d6   : > { %v1391_v25 = vadd.f32 %v1386_v52, %v2717_v51  ;;  %v2268_v53 = vpop.f32.mrb[43].mxu1  ;;  %v2357_v52 = vld [vmem:[%s2524_s17] sm:$0xff]  }
 0x9d7   : > { %v2359_v53 = vld [vmem:[%s2524_s17 + $0x10] sm:$0xff]  }
 0x9db   : > { %v1486_v54 = vpop.f32.mrb[44].mxu1 }
 0x9dc   : > { %v1493_v55 = vmul.f32 0.35355338, %v1486_v54  ;;  %v2279_v56 = vpop.f32.mrb[45].mxu1  ;;  %v2360_v54 = vld [vmem:[%s2524_s17 + $0x18] sm:$0xff]  }
 0x9dd   : > { %v1489_v57 = vpop.f32.mrb[46].mxu1  ;;  %v2362_v56 = vld [vmem:[%s2524_s17 + $0x28] sm:$0xff]  }
 0x9de   : > { %v2280_v58 = vpop.f32.mrb[47].mxu1  ;;  %v1495_v59 = vadd.f32 %v2614_v40, %v1493_v55  ;;  %v2361_v55 = vld [vmem:[%s2524_s17 + $0x20] sm:$0xff]  }
 0x9e0   : > { %v1499_v60 = vsel %vm578_vm3, %v1495_v59, -inf }
 0x9e1   : > { %1500 = vmax.xlane.f32.xlu1 %v1499_v60 }
 0x9f2   : > { %1568 = vrot.lane.b32.xlu1 %v2598_v30, %s2447_s15 }
 0xa27   : > { %v1510_v40 = vpop.xlane.xlu0 %1509 }
 0xa6e   : > { %v1501_v61 = vpop.xlane.xlu1 %1500 }
 0xa6f   : > { %v1503_v49 = vsub.f32 %v1495_v59, %v1501_v61 }
 0xa71   : > { %v1506_v62 = vmul.f32 1.442695, %v1503_v49 }
 0xa72   : > { %v1569_v63 = vpop.permute.xlu1 %1568 }
 0xa73   : > { %2391 = vpow2.f32 %v1506_v62  ;;  %v1574_v51 = vsel %vm702_vm4, %v1569_v63, 0  ;;  %v2069_v63 = vld [vmem:[%s2530_s21 + $0x2] ss:$0 sm:$0xff] }
 0xa74   : > { %2288 = vmatpush3.bf16.msra.mxu1 %v1574_v51  ;;  %2393 = vrcp.f32 %v1510_v40 }
 0xa75   : > { %2299 = vmatprep.subr.bf16.mxu1 %v2443_v3 }
 0xa7d   : > { %v2392_v0 = vpop.eup %2391 }
 0xa7e   : > { %v1511_v1 = vsel %vm578_vm3, %v2392_v0, 0.0  ;;  %v2394_v30 = vpop.eup %2393 }
 0xa7f   : > { %1512 = vadd.xlane.f32.xlu0 %v1511_v1  ;;  %v1516_v4 = vmul.f32 %v2394_v30, %v2390_v47  ;;  %v2070_v30 = vld [vmem:[%s2530_s21 + $0x3] ss:$0 sm:$0xff] }
 0xa81   : > { %v1518_v9 = vpack.c.bf16 %v1516_v4, %v1516_v4 }
 0xa95   : > { %1520 = vrot.lane.b32.xlu0 %v2596_v27, %s2447_s15 }
 0xb0c   : > { %v1513_v2 = vpop.xlane.xlu0 %1512 }
 0xb0d   : > { %2395 = vrcp.f32 %v1513_v2 }
 0xb10   : > { %v1521_v7 = vpop.permute.xlu0 %1520 }
 0xb11   : > { %v1526_v8 = vsel %vm702_vm4, %v1521_v7, 0 }
 0xb12   : > { %2282 = vmatpush3.bf16.msra.mxu0 %v1526_v8 }
 0xb13   : > { %2293 = vmatprep.subr.bf16.mxu0 %v2443_v3 }
 0xb15   : > { %2284 = vmatmul.mubr.msk.bf16.vlgmr.msra.gmra.mrb[32].mxu0 %vm578_vm3, %v1518_v9  ;;  %v2363_v9 = vld [vmem:[%s2524_s17 + $0x30] sm:$0xff]  }
 0xb16   : > { %2295 = vmatprep.mubr.msk.bf16.mxu0 %vm2444_vm1, %v2443_v3  ;;  %2294 = vmatpush3.bf16.msra.mxu0 %v1621_v14 }
 0xb17   : > { %v2396_v27 = vpop.eup %2395  ;;  %2307 = vmatprep.subr.bf16.mxu0 %v2443_v3 }
 0xb18   : > { %v1517_v10 = vmul.f32 %v2396_v27, %v2392_v0  ;;  %v2364_v27 = vld [vmem:[%s2524_s17 + $0x38] sm:$0xff]  }
 0xb1a   : > { %v1519_v11 = vpack.c.bf16 %v1517_v10, %v1517_v10  ;;  %v2071_v10 = vld [vmem:[%s326_s14] ss:$0 sm:$0xff] }
 0xb1c   : > { %2290 = vmatmul.mubr.msk.bf16.vlgmr.msra.gmra.mrb[48].mxu1 %vm578_vm3, %v1519_v11 }
 0xb1d   : > { %2303 = vmatprep.mubr.msk.bf16.mxu1 %vm2444_vm1, %v2443_v3 }
 0xbe8   : > { %v1562_v15 = vpop.f32.mrb[32].mxu0 }
 0xbe9   : > { %v2285_v16 = vpop.f32.mrb[33].mxu0 }
 0xbea   : > { %v1565_v13 = vpop.f32.mrb[34].mxu0 }
 0xbeb   : > { %v2286_v24 = vpop.f32.mrb[35].mxu0 }
 0xbef   : > { %v1610_v18 = vpop.f32.mrb[48].mxu1 }
 0xbf0   : > { %v1616_v19 = vpack.c.bf16 %v1610_v18, %v1562_v15  ;;  %v2291_v21 = vpop.f32.mrb[49].mxu1 }
 0xbf1   : > { %v1613_v22 = vpop.f32.mrb[50].mxu1  ;;  %v2075_v21 = vld [vmem:[%s2530_s21 + $0x1] ss:$0 sm:$0xff] }
 0xbf2   : > { %v2292_v23 = vpop.f32.mrb[51].mxu1  ;;  %2296 = vmatmul.mubr.msk.bf16.vlgmr.msra.gmra.mrb[36].mxu0 %vm578_vm3, %v1616_v19 }
 0xbf3   : > { %2323 = vmatprep.mubr.msk.bf16.mxu0 %vm2444_vm1, %v2443_v3  ;;  %2308 = vmatpush3.bf16.msra.mxu0 %v2357_v52 }
 0xbf4   : > { %2309 = vmatprep.subr.bf16.mxu0 %v2443_v3 }
 0xcc5   : > { %v1657_v28 = vpop.f32.mrb[36].mxu0 }
 0xcc6   : > { %v1664_v29 = vadd.f32 %v1657_v28, %v1390_v17  ;;  %v2297_v31 = vpop.f32.mrb[37].mxu0  ;;  %v2355_v17 = vld [vmem:[%s2515_s11] sm:$0xff]  }
 0xcc7   : > { %v1660_v32 = vpop.f32.mrb[38].mxu0  ;;  %2300 = vmatpush3.bf16.msra.mxu1 %v2355_v17 }
 0xcc8   : > { %v1670_v33 = vadd.f32 %v2068_v26, %v1664_v29  ;;  %v1665_v34 = vadd.f32 %v1660_v32, %v1391_v25  ;;  %v2298_v36 = vpop.f32.mrb[39].mxu0  ;;  %2301 = vmatprep.subr.bf16.mxu1 %v2443_v3  ;;  %v2358_v25 = vld [vmem:[%s2524_s17 + $0x8] sm:$0xff]  }
 0xcc9   : > { %2310 = vmatpush3.bf16.msra.mxu0 %v2358_v25 }
 0xcca   : > { %v1671_v37 = vadd.f32 %v2068_v26, %v1665_v34  ;;  %v1672_v38 = vadd.f32 %v1670_v33, %v2545_v5  ;;  %2311 = vmatprep.subr.bf16.mxu0 %v2443_v3 }
 0xccb   : > { %2302 = vmatpush3.bf16.msra.mxu1 %v2356_v20  ;;  %v2084_v20 = vld [vmem:[%s2530_s21 + $0x4] ss:$0 sm:$0xff] }
 0xccc   : > { %v1674_v39 = vsel %vm407_vm2, %v1672_v38, 0.0  ;;  %v1673_v41 = vadd.f32 %v1671_v37, %v2547_v6 }
 0xccd   : > { %1675 = vadd.xlane.f32.xlu1 %v1674_v39  ;;  %2312 = vmatpush3.bf16.msra.mxu0 %v2359_v53  ;;  %v2085_v53 = vld [vmem:[%s2530_s21 + $0x5] ss:$0 sm:$0xff] }
 0xcce   : > { %v1677_v42 = vsel %vm407_vm2, %v1673_v41, 0.0  ;;  %2313 = vmatprep.subr.bf16.mxu0 %v2443_v3 }
 0xccf   : > { %1678 = vadd.xlane.f32.xlu0 %v1677_v42 }
 0xcd1   : > { %2314 = vmatpush3.bf16.msra.mxu0 %v2360_v54 }
 0xcd2   : > { %2315 = vmatprep.subr.bf16.mxu0 %v2443_v3 }
 0xcd5   : > { %2316 = vmatpush3.bf16.msra.mxu0 %v2361_v55 }
 0xcd6   : > { %2317 = vmatprep.subr.bf16.mxu0 %v2443_v3 }
 0xcd9   : > { %2318 = vmatpush3.bf16.msra.mxu0 %v2362_v56 }
 0xcda   : > { %2319 = vmatprep.subr.bf16.mxu0 %v2443_v3 }
 0xcdd   : > { %2320 = vmatpush3.bf16.msra.mxu0 %v2363_v9 }
 0xcde   : > { %2321 = vmatprep.subr.bf16.mxu0 %v2443_v3 }
 0xce1   : > { %2322 = vmatpush3.bf16.msra.mxu0 %v2364_v27 }
 0xd5a   : > { %v1676_v43 = vpop.xlane.xlu1 %1675 }
 0xd5b   : > { %v1681_v35 = vmul.f32 0.03125, %v1676_v43 }
 0xd5c   : > { %v1679_v44 = vpop.xlane.xlu0 %1678 }
 0xd5d   : > { %v1683_v45 = vsub.f32 %v1672_v38, %v1681_v35  ;;  %v1682_v46 = vmul.f32 0.03125, %v1679_v44 }
 0xd5f   : > { %v1684_v47 = vsub.f32 %v1673_v41, %v1682_v46  ;;  %v1685_v48 = vmul.f32 %v1683_v45, %v1683_v45 }
 0xd61   : > { %v1687_v5 = vsel %vm407_vm2, %v1685_v48, 0.0  ;;  %v1686_v50 = vmul.f32 %v1684_v47, %v1684_v47 }
 0xd62   : > { %1688 = vadd.xlane.f32.xlu0 %v1687_v5 }
 0xd63   : > { %v1690_v6 = vsel %vm407_vm2, %v1686_v50, 0.0 }
 0xd64   : > { %1691 = vadd.xlane.f32.xlu1 %v1690_v6 }
 0xdef   : > { %v1689_v57 = vpop.xlane.xlu0 %1688 }
 0xdf0   : > { %v1693_v58 = vmul.f32 0.03125, %v1689_v57 }
 0xdf1   : > { %v1692_v59 = vpop.xlane.xlu1 %1691 }
 0xdf2   : > { %v1695_v60 = vadd.f32 1e-05, %v1693_v58  ;;  %v1694_v61 = vmul.f32 0.03125, %v1692_v59 }
 0xdf4   : > { %2397 = vrsqrt.f32 %v1695_v60  ;;  %v1696_v49 = vadd.f32 1e-05, %v1694_v61 }
 0xdf6   : > { %2399 = vrsqrt.f32 %v1696_v49 }
 0xdfe   : > { %v2398_v62 = vpop.eup %2397 }
 0xdff   : > { %v1699_v51 = vmul.f32 %v2398_v62, %v1683_v45 }
 0xe00   : > { %v2400_v0 = vpop.eup %2399 }
 0xe01   : > { %v1705_v1 = vmul.f32 %v2069_v63, %v1699_v51  ;;  %v1700_v40 = vmul.f32 %v2400_v0, %v1684_v47 }
 0xe03   : > { %v1706_v2 = vmul.f32 %v2069_v63, %v1700_v40  ;;  %v1711_v4 = vadd.f32 %v2070_v30, %v1705_v1 }
 0xe05   : > { %v1712_v7 = vadd.f32 %v2070_v30, %v1706_v2 }
 0xe07   : > { %v1713_v8 = vpack.c.bf16 %v1712_v7, %v1711_v4 }
 0xe09   : > { %2304 = vmatmul.mubr.msk.bf16.vlgmr.msra.gmra.mrb[52].mxu1 %vm407_vm2, %v1713_v8 }
 0xedc   : > { %v1769_v11 = vpop.f32.mrb[52].mxu1 }
 0xedd   : > { %v1770_v12 = vadd.f32 %v2071_v10, %v1769_v11  ;;  %v2305_v14 = vpop.f32.mrb[53].mxu1 }
 0xede   : > { %v1772_v15 = vpop.f32.mrb[54].mxu1 }
 0xedf   : > { %v1773_v16 = vadd.f32 %v2071_v10, %v1772_v15  ;;  %v2306_v13 = vpop.f32.mrb[55].mxu1  ;;  %v1776_v24 = vmax.f32 %v1770_v12, 0.0 }
 0xee1   : > { %v1777_v18 = vmax.f32 %v1773_v16, 0.0 }
 0xee3   : > { %v1778_v19 = vpack.c.bf16 %v1777_v18, %v1776_v24 }
 0xee5   : > { %2324 = vmatmul.mubr.bf16.vlgmr.msra.gmra.mrb[40].mxu0 %v1778_v19 }
 0xfb8   : > { %v1865_v22 = vpop.f32.mrb[40].mxu0 }
 0xfb9   : > { %v1866_v3 = vadd.f32 %v2075_v21, %v1865_v22  ;;  %v2325_v23 = vpop.f32.mrb[41].mxu0 }
 0xfba   : > { %v1868_v26 = vpop.f32.mrb[42].mxu0 }
 0xfbb   : > { %v1869_v28 = vadd.f32 %v2075_v21, %v1868_v26  ;;  %v2326_v29 = vpop.f32.mrb[43].mxu0  ;;  %v1872_v31 = vadd.f32 %v1866_v3, %v1711_v4 }
 0xfbd   : > { %v1874_v32 = vsel %vm407_vm2, %v1872_v31, 0.0  ;;  %v1873_v33 = vadd.f32 %v1869_v28, %v1712_v7 }
 0xfbe   : > { %1875 = vadd.xlane.f32.xlu0 %v1874_v32 }
 0xfbf   : > { %v1877_v34 = vsel %vm407_vm2, %v1873_v33, 0.0 }
 0xfc0   : > { %1878 = vadd.xlane.f32.xlu1 %v1877_v34 }
0x104b   : > { %v1876_v36 = vpop.xlane.xlu0 %1875 }
0x104c   : > { %v1880_v37 = vmul.f32 0.03125, %v1876_v36 }
0x104d   : > { %v1879_v38 = vpop.xlane.xlu1 %1878 }
0x104e   : > { %v1882_v39 = vsub.f32 %v1872_v31, %v1880_v37  ;;  %v1881_v41 = vmul.f32 0.03125, %v1879_v38 }
0x1050   : > { %v1883_v42 = vsub.f32 %v1873_v33, %v1881_v41  ;;  %v1884_v43 = vmul.f32 %v1882_v39, %v1882_v39 }
0x1052   : > { %v1886_v35 = vsel %vm407_vm2, %v1884_v43, 0.0  ;;  %v1885_v44 = vmul.f32 %v1883_v42, %v1883_v42 }
0x1053   : > { %1887 = vadd.xlane.f32.xlu0 %v1886_v35 }
0x1054   : > { %v1889_v45 = vsel %vm407_vm2, %v1885_v44, 0.0 }
0x1055   : > { %1890 = vadd.xlane.f32.xlu1 %v1889_v45 }
0x10e0   : > { %v1888_v46 = vpop.xlane.xlu0 %1887 }
0x10e1   : > { %v1892_v47 = vmul.f32 0.03125, %v1888_v46 }
0x10e2   : > { %v1891_v48 = vpop.xlane.xlu1 %1890 }
0x10e3   : > { %v1894_v5 = vadd.f32 1e-05, %v1892_v47  ;;  %v1893_v50 = vmul.f32 0.03125, %v1891_v48 }
0x10e5   : > { %2401 = vrsqrt.f32 %v1894_v5  ;;  %v1895_v6 = vadd.f32 1e-05, %v1893_v50 }
0x10e7   : > { %2403 = vrsqrt.f32 %v1895_v6 }
0x10ef   : > { %v2402_v17 = vpop.eup %2401 }
0x10f0   : > { %v1898_v52 = vmul.f32 %v2402_v17, %v1882_v39 }
0x10f1   : > { %v2404_v25 = vpop.eup %2403 }
0x10f2   : > { %v1904_v54 = vmul.f32 %v2084_v20, %v1898_v52  ;;  %v1899_v55 = vmul.f32 %v2404_v25, %v1883_v42  ;;  %1917 = sbr.rel (%p2086_p5) target bundleno = 4345 (0x10f9), region = 56 }
0x10f4   : > { %v1910_v56 = vadd.f32 %v2085_v53, %v1904_v54  ;;  %v1905_v57 = vmul.f32 %v2084_v20, %v1899_v55 }
0x10f6   : > { %1912 = vst.msk [vmem:[#allocation2] sm:$0xff] %vm407_vm2, %v1910_v56  ;;  %v1911_v58 = vadd.f32 %v2085_v53, %v1905_v57  ;;  %1918 = vst.msk [vmem:[#allocation3] sm:$0xff] (!%p2086_p5), %vm407_vm2, %v1910_v56 }
0x10f8   : > { %1913 = vst.msk [vmem:[#allocation2 + $0x8] sm:$0xff] %vm407_vm2, %v1911_v58  ;;  %1919 = vst.msk [vmem:[#allocation3 + $0x8] sm:$0xff] (!%p2086_p5), %vm407_vm2, %v1911_v58 }
0x10f9 PF: > { %p2331_p6 = scmp.eq.s32.totalorder %s2497_s25, 1  ;;  %s2448_s26 = smov [#allocation3]  }
0x10fa   : > { %s1926_s14 = sshll.u32 %s2448_s26, 4  ;;  %s1927_s14 = int_to_ptr.vmem [resolvable:$true] %s1926_s14 }
0x10fb   : > { %s2405_s16 = scalar_lea.vmem %s1927_s14, 256  ;;  %p2412_p10 = scmp.lt.s32.totalorder %s1927_s14, %s1927_s14 }
0x10fc   : > { %p2406_p7 = scmp.ne.s32.totalorder %s1927_s14, %s2405_s16  ;;  %p2413_p11 = scmp.lt.s32.totalorder %s2405_s16, %s2405_s16 }
0x10fe   : > { %p2407_p8 = pnand %p2406_p7, %p2331_p6  ;;  %p2414_p12 = por %p2413_p11, %p2412_p10 }
0x1100   : > { %p2408_p9 = pneg %p2407_p8 }
0x1102   : > { %p2415_p13 = pnand %p2414_p12, %p2408_p9 }
0x1104   : > { %2418 = shalt.err (!%p2415_p13)
}
0x1105   : > { %s2419_s19 = scalar_lea.hbm %s2857_s7, 256 }
0x1106   : > { %p2420_p0 = scmp.ne.s32.totalorder %s2857_s7, %s2419_s19  ;;  %p2425_p3 = scmp.lt.u32.totalorder %s2419_s19, %s2857_s7 }
0x1108   : > { %p2421_p1 = pnand %p2420_p0, %p2331_p6 }
0x110a   : > { %p2422_p2 = pneg %p2421_p1 }
0x110c   : > { %p2427_p4 = pnand %p2425_p3, %p2422_p2 }
0x110e   : > { %2430 = shalt.err (!%p2427_p4)
}
0x110f   : > { %s2449_s28 = smov 128   ;;  %s2450_s29 = smov 8  }
0x1110   : > { %2328 = dma.vmem_to_hbm [thread:$0]  (%p2331_p6), %s1927_s14, 256, %s2857_s7, [#allocation4], %s2449_s28, %s2449_s28, %s2450_s29  }
0x1111   : > { %2436 = dma.done.wait (%p2331_p6), [#allocation4], 256  }
0x1112   : > { %2438 = vsyncadd (%p2331_p6), [#allocation4], 4294967040 }
0x1113 PF: > { %s18_s24 = sadd.s32 1, %s2441_s24  }
0x1114   : > { %p15_p5 = scmp.ge.s32.totalorder %s18_s24, 4  }
0x1116   :  { %17 = sbr.rel (!%p15_p5) target bundleno = 1 (0x1), region = 98 }
0x111d   :  { %1942 = vsyncpa [#allocation4], 1 }
0x111e   :  { %1944 = vsyncpa [#allocation4 + $0x1], 1 }

</bundles_post_ra>
